<compile_context>
chip_gen: v6e
topology: v6e:2x2x1
jax: 0.10.0
libtpu: 0.0.40
codegen_flags: <defaults>
</compile_context>

<pallas_src>
import jax
import jax.numpy as jnp
import numpy as np
from jax.experimental import pallas as pl
from jax.experimental.pallas import tpu as pltpu


# ----------------------------- Pallas kernel ------------------------------

def make_attention_kernel(num_heads, head_dim, store_attn, bf16_softmax):
    def kernel(xq_ref, xk_ref, xv_ref, wqkv_ref, bqkv_ref, wp_ref, bp_ref,
               out_ref, *attn_refs):
        eps = 1e-5  # PyTorch LayerNorm default

        def layernorm_cf(x):
            # x: [Cin, L]; normalize over the channel (sublane) axis.
            mu = jnp.mean(x, axis=0, keepdims=True)
            xc = x - mu
            var = jnp.mean(xc * xc, axis=0, keepdims=True)
            return xc * jax.lax.rsqrt(var + eps)

        # LayerNorm (affine folded into the weights), then cast activations to
        # bf16 so every projection matmul is a single-pass bf16 MXU op.
        xq = layernorm_cf(xq_ref[0]).astype(jnp.bfloat16)   # [Cin, LQT]
        xk = layernorm_cf(xk_ref[0]).astype(jnp.bfloat16)   # [Cin, Lkv]
        xv = layernorm_cf(xv_ref[0]).astype(jnp.bfloat16)   # [Cin, Lkv]

        # Projections (channels-first).  LN affine + softmax scale are folded
        # into the (pre-transposed, bf16) weights / (f32) biases.
        q = jnp.dot(wqkv_ref[0], xq, preferred_element_type=jnp.float32) + bqkv_ref[0]  # [Dout, LQT]
        k = jnp.dot(wqkv_ref[1], xk, preferred_element_type=jnp.float32) + bqkv_ref[1]  # [Dout, Lkv]
        v = jnp.dot(wqkv_ref[2], xv, preferred_element_type=jnp.float32) + bqkv_ref[2]  # [Dout, Lkv]

        # One bf16 transpose of q (instead of num_heads small f32 transposes).
        qT = jnp.transpose(q.astype(jnp.bfloat16))           # [LQT, Dout]
        k16 = k.astype(jnp.bfloat16)                         # [Dout, Lkv]
        v16 = v.astype(jnp.bfloat16)                         # [Dout, Lkv]
        wp16 = wp_ref[...]                                    # [Dout, Dout] bf16

        lkv = k16.shape[1]
        ones_row = jnp.ones((1, lkv), dtype=jnp.bfloat16)     # for MXU row-sums

        acc = None
        for h in range(num_heads):                             # static unrolled head loop
            lo, hi = h * head_dim, (h + 1) * head_dim

            # scores [LQT, Lkv]; softmax scale already folded into q.
            s = jnp.dot(qT[:, lo:hi], k16[lo:hi, :],
                        preferred_element_type=jnp.float32)
            if store_attn:
                attn_refs[0][0, h] = s.astype(attn_refs[0].dtype)  # bf16 writeback

            m = jnp.max(s, axis=-1, keepdims=True)             # [LQT, 1]
            if bf16_softmax:
                # v6e/v7x: native bf16 EUP/VPU -> cheaper exp.
                p16 = jnp.exp((s - m).astype(jnp.bfloat16))
            else:
                # v5e and older: no bf16 VPU/EUP datapath; keep exp in f32.
                p16 = jnp.exp(s - m).astype(jnp.bfloat16)

            # Row-sum as a ones-row matmul: f32 MXU accumulation, result lands
            # directly in the lane-major [1, LQT] layout needed below.
            r_row = jax.lax.dot_general(
                ones_row, p16, (((1,), (1,)), ((), ())),
                preferred_element_type=jnp.float32)            # [1, LQT]
            inv_row = pl.reciprocal(r_row, approx=True)        # EUP

            # Unnormalized head output (channels-first): [hd, LQT] = vh @ p^T.
            oh = jax.lax.dot_general(
                v16[lo:hi, :], p16, (((1,), (1,)), ((), ())),
                preferred_element_type=jnp.float32)
            # Deferred softmax normalization: hd*LQT multiplies instead of
            # LQT*Lkv (exp(s-m) <= 1, so the unnormalized bf16 p cannot overflow).
            oh = oh * inv_row

            # Fold this head straight into the output-projection accumulator.
            contrib = jnp.dot(wp16[:, lo:hi], oh.astype(jnp.bfloat16),
                              preferred_element_type=jnp.float32)  # [Dout, LQT]
            acc = contrib if acc is None else acc + contrib

        out_ref[0] = acc + bp_ref[...]                          # lane-dense [Dout, LQT]

    return kernel


def _bf16_softmax_default():
    # bf16 exp only on chips with a bf16 VPU/EUP datapath (v6e, v7x, ...).
    try:
        kind = jax.devices()[0].device_kind.lower()
    except Exception:
        return True
    for old in ('v2', 'v3', 'v4', 'v5'):
        if old in kind:
            return False
    return True


def attention_core(qc_cf, kc_cf, vc_cf, params, num_heads, scale,
                   store_attn=True, channels_first_out=False,
                   bf16_softmax=None):
    """Channels-first inputs: qc_cf [B, Cin, Lq], kc_cf/vc_cf [B, Cin, Lkv]."""
    if bf16_softmax is None:
        bf16_softmax = _bf16_softmax_default()

    B, Cin, Lq = qc_cf.shape
    Lkv = kc_cf.shape[2]
    Dout = params['wq'].shape[1]
    head_dim = Dout // num_heads

    # Fold the LayerNorm affine (gamma, beta) and the softmax scale into the
    # projection weights at trace time; pre-transpose for channels-first
    # matmuls and pre-cast weights to bf16 (single-pass MXU, half the DMA).
    def fold(g, b, w, s):
        w_f = s * (g.reshape(-1, 1) * w)     # [Cin, Dout]
        b_f = s * (b.reshape(1, -1) @ w)     # [1,   Dout]
        return w_f.T, b_f.T                  # [Dout, Cin], [Dout, 1]

    wqT, bq = fold(params['gq'], params['bq'], params['wq'], scale)
    wkT, bk = fold(params['gk'], params['bk'], params['wk'], 1.0)
    wvT, bv = fold(params['gv'], params['bv'], params['wv'], 1.0)
    wqkvT = jnp.stack([wqT, wkT, wvT]).astype(jnp.bfloat16)   # [3, Dout, Cin] bf16
    bqkv = jnp.stack([bq, bk, bv])                            # [3, Dout, 1]   f32
    wpT = params['wp'].T.astype(jnp.bfloat16)                 # [Dout, Dout]   bf16
    bp = params['bp'].reshape(1, -1).T                        # [Dout, 1]      f32

    # Lq-tile grid axis: >1 pipeline step per batch element so the score
    # writeback / input DMAs overlap compute, and bounded per-step VMEM for
    # v7x's 64 MiB.  k/v projections are recomputed per Lq tile (Cin x Dout is
    # tiny) so both grid axes stay "parallel" (megacore-friendly).
    lq_tile = Lq
    if Lq % 128 == 0:
        lq_tile = 128
        while lq_tile * 2 <= min(Lq, 512) and Lq % (lq_tile * 2) == 0:
            lq_tile *= 2
    n_lq = Lq // lq_tile

    kernel = make_attention_kernel(num_heads, head_dim, store_attn, bf16_softmax)

    in_specs = [
        pl.BlockSpec((1, Cin, lq_tile), lambda b, j: (b, 0, j)),
        pl.BlockSpec((1, Cin, Lkv), lambda b, j: (b, 0, 0)),
        pl.BlockSpec((1, Cin, Lkv), lambda b, j: (b, 0, 0)),
        pl.BlockSpec((3, Dout, Cin), lambda b, j: (0, 0, 0)),
        pl.BlockSpec((3, Dout, 1), lambda b, j: (0, 0, 0)),
        pl.BlockSpec((Dout, Dout), lambda b, j: (0, 0)),
        pl.BlockSpec((Dout, 1), lambda b, j: (0, 0)),
    ]
    out_specs = [pl.BlockSpec((1, Dout, lq_tile), lambda b, j: (b, 0, j))]
    out_shape = [jax.ShapeDtypeStruct((B, Dout, Lq), jnp.float32)]
    if store_attn:
        # Pre-softmax scores stored bf16: halves the dominant HBM writeback.
        out_specs.append(pl.BlockSpec((1, num_heads, lq_tile, Lkv),
                                      lambda b, j: (b, 0, j, 0)))
        out_shape.append(jax.ShapeDtypeStruct((B, num_heads, Lq, Lkv),
                                              jnp.bfloat16))

    results = pl.pallas_call(
        kernel,
        grid=(B, n_lq),
        in_specs=in_specs,
        out_specs=out_specs,
        out_shape=out_shape,
        compiler_params=pltpu.CompilerParams(
            dimension_semantics=("parallel", "parallel")),
    )(qc_cf, kc_cf, vc_cf, wqkvT, bqkv, wpT, bp)

    out_cf = results[0]
    attn = results[1] if store_attn else None
    if channels_first_out:
        return attn, out_cf                  # [B, Dout, Lq], no extra HBM round trip
    # TODO(synk): a channels-first consumer should pass channels_first_out=True
    # and skip this transpose; kept here to match the module's output layout.
    out = jnp.transpose(out_cf, (0, 2, 1))   # back to the module's 'b t (h d)' layout
    return attn, out


# ------------------------------- JAX glue ---------------------------------

def depthwise_conv3d(x, w, pad):
    # x: [B, C, T, H, W], w: [C, 1, kt, kh, kw], groups = C (depthwise)
    return jax.lax.conv_general_dilated(
        x, w, window_strides=(1, 1, 1),
        padding=[(pad, pad)] * 3,
        dimension_numbers=('NCDHW', 'OIDHW', 'NCDHW'),
        feature_group_count=x.shape[1])


def to_cf_seq(y):  # 'b c t h w -> b c (t h w)'   (free reshape, no transpose)
    B, C, T, H, W = y.shape
    return y.reshape(B, C, T * H * W)


def to_seq(y):     # 'b c t h w -> b (t h w) c'   (reference path only)
    B, C, T, H, W = y.shape
    return jnp.transpose(y, (0, 2, 3, 4, 1)).reshape(B, T * H * W, C)


def attention_forward(x, h, w, messages, params, fea_no, num_heads, scale,
                      audio_cond=None, store_attn=True, channels_first_out=False):
    """x: [B, fea_no*h*w, Cin]  ->  [B, fea_no*h*w, Dout]."""
    B, L, Cin = x.shape
    x5 = x.reshape(B, fea_no, h, w, Cin).transpose(0, 4, 1, 2, 3)  # NCDHW
    if audio_cond is not None:
        a5 = audio_cond.reshape(B, fea_no, h, w, Cin).transpose(0, 4, 1, 2, 3)
        kc = to_cf_seq(depthwise_conv3d(a5, params['wc_k'], 1))
    else:
        kc = to_cf_seq(depthwise_conv3d(x5, params['wc_k'], 1))
    qc = to_cf_seq(depthwise_conv3d(x5, params['wc_q'], 1))
    vc = to_cf_seq(depthwise_conv3d(x5, params['wc_v'], 1))

    attn_score, out = attention_core(qc, kc, vc, params, num_heads, scale,
                                     store_attn=store_attn,
                                     channels_first_out=channels_first_out)
    if store_attn:
        messages['attn'] = attn_score
    return out


# --------------------------- pure-JAX reference ----------------------------

def reference_core(qc, kc, vc, params, num_heads, scale):
    def ln(x, g, b):
        mu = x.mean(-1, keepdims=True)
        var = ((x - mu) ** 2).mean(-1, keepdims=True)
        return (x - mu) / jnp.sqrt(var + 1e-5) * g + b

    q = ln(qc, params['gq'][0], params['bq'][0]) @ params['wq']
    k = ln(kc, params['gk'][0], params['bk'][0]) @ params['wk']
    v = ln(vc, params['gv'][0], params['bv'][0]) @ params['wv']
    B, Lq, D = q.shape
    hd = D // num_heads
    qh = q.reshape(B, Lq, num_heads, hd).transpose(0, 2, 1, 3)
    kh = k.reshape(B, -1, num_heads, hd).transpose(0, 2, 1, 3)
    vh = v.reshape(B, -1, num_heads, hd).transpose(0, 2, 1, 3)
    s = jnp.einsum('bhld,bhtd->bhlt', qh, kh) * scale
    p = jax.nn.softmax(s, axis=-1)
    o = jnp.einsum('bhlt,bhtd->bhld', p, vh)
    o = o.transpose(0, 2, 1, 3).reshape(B, Lq, D)
    return s, o @ params['wp'] + params['bp'][0]


# --------------------------------- main ------------------------------------

if __name__ == "__main__":
    # Module hyperparameters (small, consistent with the forward pass).
    B, FEA_NO, H, W = 2, 2, 8, 8
    DIM_IN, DIM_OUT, NUM_HEADS = 8, 32, 2
    SCALE = DIM_OUT ** (-0.5)

    key = jax.random.PRNGKey(0)
    keys = jax.random.split(key, 16)

    params = {
        # depthwise conv weights: q uses (3,3,3), k/v use (1,3,3) kernels.
        'wc_q': 0.1 * jax.random.normal(keys[0], (DIM_IN, 1, 3, 3, 3), jnp.float32),
        'wc_k': 0.1 * jax.random.normal(keys[1], (DIM_IN, 1, 1, 3, 3), jnp.float32),
        'wc_v': 0.1 * jax.random.normal(keys[2], (DIM_IN, 1, 1, 3, 3), jnp.float32),
        # LayerNorm affine params (stored as (1, Cin)).
        'gq': 1.0 + 0.05 * jax.random.normal(keys[3], (1, DIM_IN), jnp.float32),
        'bq': 0.05 * jax.random.normal(keys[4], (1, DIM_IN), jnp.float32),
        'gk': 1.0 + 0.05 * jax.random.normal(keys[5], (1, DIM_IN), jnp.float32),
        'bk': 0.05 * jax.random.normal(keys[6], (1, DIM_IN), jnp.float32),
        'gv': 1.0 + 0.05 * jax.random.normal(keys[7], (1, DIM_IN), jnp.float32),
        'bv': 0.05 * jax.random.normal(keys[8], (1, DIM_IN), jnp.float32),
        # Linear projections (qkv_bias=False in the module defaults).
        'wq': jax.random.normal(keys[9], (DIM_IN, DIM_OUT), jnp.float32) / np.sqrt(DIM_IN),
        'wk': jax.random.normal(keys[10], (DIM_IN, DIM_OUT), jnp.float32) / np.sqrt(DIM_IN),
        'wv': jax.random.normal(keys[11], (DIM_IN, DIM_OUT), jnp.float32) / np.sqrt(DIM_IN),
        # output projection (with bias).
        'wp': jax.random.normal(keys[12], (DIM_OUT, DIM_OUT), jnp.float32) / np.sqrt(DIM_OUT),
        'bp': 0.05 * jax.random.normal(keys[13], (1, DIM_OUT), jnp.float32),
    }

    x = jax.random.normal(keys[14], (B, FEA_NO * H * W, DIM_IN), jnp.float32)

    messages = {}
    out = attention_forward(x, H, W, messages, params, FEA_NO, NUM_HEADS, SCALE)
    out = jax.block_until_ready(out)
    attn = jax.block_until_ready(messages['attn'])

    # Cross-check against a pure-JAX reference of the post-conv hot path.
    x5 = x.reshape(B, FEA_NO, H, W, DIM_IN).transpose(0, 4, 1, 2, 3)
    qc = to_seq(depthwise_conv3d(x5, params['wc_q'], 1))
    kc = to_seq(depthwise_conv3d(x5, params['wc_k'], 1))
    vc = to_seq(depthwise_conv3d(x5, params['wc_v'], 1))
    ref_attn, ref_out = reference_core(qc, kc, vc, params, NUM_HEADS, SCALE)

    # bf16 MXU operands, bf16 attn storage + approx reciprocal -> loose atol.
    np.testing.assert_allclose(np.asarray(attn.astype(jnp.float32)),
                               np.asarray(ref_attn), rtol=2e-2, atol=5e-2)
    np.testing.assert_allclose(np.asarray(out), np.asarray(ref_out),
                               rtol=2e-2, atol=5e-2)

    # TODO(synk): dropout (attn_drop / proj_drop) is identity here (p=0.0 / eval mode).
    print("KERNEL_OK")
</pallas_src>

<mosaic_0001>
module attributes {stable_mosaic.version = 11 : i64} {
  func.func @kernel(%arg0: i32, %arg1: i32, %arg2: memref<1x8x128xf32, #tpu.memory_space<vmem>>, %arg3: memref<1x8x256xf32, #tpu.memory_space<vmem>>, %arg4: memref<1x8x256xf32, #tpu.memory_space<vmem>>, %arg5: memref<3x32x8xbf16, #tpu.memory_space<vmem>>, %arg6: memref<3x32x1xf32, #tpu.memory_space<vmem>>, %arg7: memref<32x32xbf16, #tpu.memory_space<vmem>>, %arg8: memref<32x1xf32, #tpu.memory_space<vmem>>, %arg9: memref<1x32x128xf32, #tpu.memory_space<vmem>>, %arg10: memref<1x2x128x256xbf16, #tpu.memory_space<vmem>>) attributes {dimension_semantics = [#tpu.dimension_semantics<parallel>, #tpu.dimension_semantics<parallel>], iteration_bounds = array<i64: 2, 1>, scalar_prefetch = 0 : i64, scratch_operands = 0 : i64, tpu.core_type = #tpu.core_type<tc>, window_params = [{transform_indices = @transform_0, window_bounds = array<i64: 1, 8, 128>}, {transform_indices = @transform_1, window_bounds = array<i64: 1, 8, 256>}, {transform_indices = @transform_2, window_bounds = array<i64: 1, 8, 256>}, {pipeline_mode = #tpu.pipeline_mode<synchronous>, transform_indices = @transform_3, window_bounds = array<i64: 3, 32, 8>}, {pipeline_mode = #tpu.pipeline_mode<synchronous>, transform_indices = @transform_4, window_bounds = array<i64: 3, 32, 1>}, {pipeline_mode = #tpu.pipeline_mode<synchronous>, transform_indices = @transform_5, window_bounds = array<i64: 32, 32>}, {pipeline_mode = #tpu.pipeline_mode<synchronous>, transform_indices = @transform_6, window_bounds = array<i64: 32, 1>}, {transform_indices = @transform_7, window_bounds = array<i64: 1, 32, 128>}, {transform_indices = @transform_8, window_bounds = array<i64: 1, 2, 128, 256>}]} {
    %c0 = arith.constant 0 : index
    %c0_0 = arith.constant 0 : index
    %c0_1 = arith.constant 0 : index
    %0 = vector.load %arg2[%c0, %c0_0, %c0_1] : memref<1x8x128xf32, #tpu.memory_space<vmem>>, vector<1x8x128xf32>
    %1 = vector.shape_cast %0 : vector<1x8x128xf32> to vector<8x128xf32>
    %cst = arith.constant dense<0.000000e+00> : vector<128xf32>
    %2 = vector.multi_reduction <add>, %1, %cst [0] : vector<8x128xf32> to vector<128xf32>
    %3 = vector.shape_cast %2 : vector<128xf32> to vector<1x128xf32>
    %cst_2 = arith.constant 8.000000e+00 : f32
    %4 = vector.broadcast %cst_2 : f32 to vector<1x128xf32>
    %5 = arith.divf %3, %4 : vector<1x128xf32>
    %6 = vector.broadcast %5 : vector<1x128xf32> to vector<8x128xf32>
    %7 = arith.subf %1, %6 : vector<8x128xf32>
    %8 = arith.mulf %7, %7 : vector<8x128xf32>
    %cst_3 = arith.constant dense<0.000000e+00> : vector<128xf32>
    %9 = vector.multi_reduction <add>, %8, %cst_3 [0] : vector<8x128xf32> to vector<128xf32>
    %10 = vector.shape_cast %9 : vector<128xf32> to vector<1x128xf32>
    %cst_4 = arith.constant 8.000000e+00 : f32
    %11 = vector.broadcast %cst_4 : f32 to vector<1x128xf32>
    %12 = arith.divf %10, %11 : vector<1x128xf32>
    %cst_5 = arith.constant 9.99999974E-6 : f32
    %13 = vector.broadcast %cst_5 : f32 to vector<1x128xf32>
    %14 = arith.addf %12, %13 : vector<1x128xf32>
    %15 = math.rsqrt %14 : vector<1x128xf32>
    %16 = vector.broadcast %15 : vector<1x128xf32> to vector<8x128xf32>
    %17 = arith.mulf %7, %16 : vector<8x128xf32>
    %18 = arith.truncf %17 : vector<8x128xf32> to vector<8x128xbf16>
    %c0_6 = arith.constant 0 : index
    %c0_7 = arith.constant 0 : index
    %c0_8 = arith.constant 0 : index
    %19 = vector.load %arg3[%c0_6, %c0_7, %c0_8] : memref<1x8x256xf32, #tpu.memory_space<vmem>>, vector<1x8x256xf32>
    %20 = vector.shape_cast %19 : vector<1x8x256xf32> to vector<8x256xf32>
    %cst_9 = arith.constant dense<0.000000e+00> : vector<256xf32>
    %21 = vector.multi_reduction <add>, %20, %cst_9 [0] : vector<8x256xf32> to vector<256xf32>
    %22 = vector.shape_cast %21 : vector<256xf32> to vector<1x256xf32>
    %cst_10 = arith.constant 8.000000e+00 : f32
    %23 = vector.broadcast %cst_10 : f32 to vector<1x256xf32>
    %24 = arith.divf %22, %23 : vector<1x256xf32>
    %25 = vector.broadcast %24 : vector<1x256xf32> to vector<8x256xf32>
    %26 = arith.subf %20, %25 : vector<8x256xf32>
    %27 = arith.mulf %26, %26 : vector<8x256xf32>
    %cst_11 = arith.constant dense<0.000000e+00> : vector<256xf32>
    %28 = vector.multi_reduction <add>, %27, %cst_11 [0] : vector<8x256xf32> to vector<256xf32>
    %29 = vector.shape_cast %28 : vector<256xf32> to vector<1x256xf32>
    %cst_12 = arith.constant 8.000000e+00 : f32
    %30 = vector.broadcast %cst_12 : f32 to vector<1x256xf32>
    %31 = arith.divf %29, %30 : vector<1x256xf32>
    %cst_13 = arith.constant 9.99999974E-6 : f32
    %32 = vector.broadcast %cst_13 : f32 to vector<1x256xf32>
    %33 = arith.addf %31, %32 : vector<1x256xf32>
    %34 = math.rsqrt %33 : vector<1x256xf32>
    %35 = vector.broadcast %34 : vector<1x256xf32> to vector<8x256xf32>
    %36 = arith.mulf %26, %35 : vector<8x256xf32>
    %37 = arith.truncf %36 : vector<8x256xf32> to vector<8x256xbf16>
    %c0_14 = arith.constant 0 : index
    %c0_15 = arith.constant 0 : index
    %c0_16 = arith.constant 0 : index
    %38 = vector.load %arg4[%c0_14, %c0_15, %c0_16] : memref<1x8x256xf32, #tpu.memory_space<vmem>>, vector<1x8x256xf32>
    %39 = vector.shape_cast %38 : vector<1x8x256xf32> to vector<8x256xf32>
    %cst_17 = arith.constant dense<0.000000e+00> : vector<256xf32>
    %40 = vector.multi_reduction <add>, %39, %cst_17 [0] : vector<8x256xf32> to vector<256xf32>
    %41 = vector.shape_cast %40 : vector<256xf32> to vector<1x256xf32>
    %cst_18 = arith.constant 8.000000e+00 : f32
    %42 = vector.broadcast %cst_18 : f32 to vector<1x256xf32>
    %43 = arith.divf %41, %42 : vector<1x256xf32>
    %44 = vector.broadcast %43 : vector<1x256xf32> to vector<8x256xf32>
    %45 = arith.subf %39, %44 : vector<8x256xf32>
    %46 = arith.mulf %45, %45 : vector<8x256xf32>
    %cst_19 = arith.constant dense<0.000000e+00> : vector<256xf32>
    %47 = vector.multi_reduction <add>, %46, %cst_19 [0] : vector<8x256xf32> to vector<256xf32>
    %48 = vector.shape_cast %47 : vector<256xf32> to vector<1x256xf32>
    %cst_20 = arith.constant 8.000000e+00 : f32
    %49 = vector.broadcast %cst_20 : f32 to vector<1x256xf32>
    %50 = arith.divf %48, %49 : vector<1x256xf32>
    %cst_21 = arith.constant 9.99999974E-6 : f32
    %51 = vector.broadcast %cst_21 : f32 to vector<1x256xf32>
    %52 = arith.addf %50, %51 : vector<1x256xf32>
    %53 = math.rsqrt %52 : vector<1x256xf32>
    %54 = vector.broadcast %53 : vector<1x256xf32> to vector<8x256xf32>
    %55 = arith.mulf %45, %54 : vector<8x256xf32>
    %56 = arith.truncf %55 : vector<8x256xf32> to vector<8x256xbf16>
    %c0_22 = arith.constant 0 : index
    %c0_23 = arith.constant 0 : index
    %c0_24 = arith.constant 0 : index
    %57 = vector.load %arg5[%c0_22, %c0_23, %c0_24] : memref<3x32x8xbf16, #tpu.memory_space<vmem>>, vector<1x32x8xbf16>
    %58 = vector.shape_cast %57 : vector<1x32x8xbf16> to vector<32x8xbf16>
    %cst_25 = arith.constant dense<0.000000e+00> : vector<32x128xf32>
    %59 = tpu.matmul %58, %18, %cst_25 {dimension_numbers = #tpu.dot_dimension_numbers<[1], [0], [0], [1], [0, 0, 1, 1], [], []>} : vector<32x8xbf16>, vector<8x128xbf16>, vector<32x128xf32> -> vector<32x128xf32>
    %c0_26 = arith.constant 0 : index
    %c0_27 = arith.constant 0 : index
    %c0_28 = arith.constant 0 : index
    %60 = vector.load %arg6[%c0_26, %c0_27, %c0_28] : memref<3x32x1xf32, #tpu.memory_space<vmem>>, vector<1x32x1xf32>
    %61 = vector.shape_cast %60 : vector<1x32x1xf32> to vector<32x1xf32>
    %62 = vector.broadcast %61 : vector<32x1xf32> to vector<32x128xf32>
    %63 = arith.addf %59, %62 : vector<32x128xf32>
    %c1 = arith.constant 1 : index
    %c0_29 = arith.constant 0 : index
    %c0_30 = arith.constant 0 : index
    %64 = vector.load %arg5[%c1, %c0_29, %c0_30] : memref<3x32x8xbf16, #tpu.memory_space<vmem>>, vector<1x32x8xbf16>
    %65 = vector.shape_cast %64 : vector<1x32x8xbf16> to vector<32x8xbf16>
    %cst_31 = arith.constant dense<0.000000e+00> : vector<32x256xf32>
    %66 = tpu.matmul %65, %37, %cst_31 {dimension_numbers = #tpu.dot_dimension_numbers<[1], [0], [0], [1], [0, 0, 1, 1], [], []>} : vector<32x8xbf16>, vector<8x256xbf16>, vector<32x256xf32> -> vector<32x256xf32>
    %c1_32 = arith.constant 1 : index
    %c0_33 = arith.constant 0 : index
    %c0_34 = arith.constant 0 : index
    %67 = vector.load %arg6[%c1_32, %c0_33, %c0_34] : memref<3x32x1xf32, #tpu.memory_space<vmem>>, vector<1x32x1xf32>
    %68 = vector.shape_cast %67 : vector<1x32x1xf32> to vector<32x1xf32>
    %69 = vector.broadcast %68 : vector<32x1xf32> to vector<32x256xf32>
    %70 = arith.addf %66, %69 : vector<32x256xf32>
    %c2 = arith.constant 2 : index
    %c0_35 = arith.constant 0 : index
    %c0_36 = arith.constant 0 : index
    %71 = vector.load %arg5[%c2, %c0_35, %c0_36] : memref<3x32x8xbf16, #tpu.memory_space<vmem>>, vector<1x32x8xbf16>
    %72 = vector.shape_cast %71 : vector<1x32x8xbf16> to vector<32x8xbf16>
    %cst_37 = arith.constant dense<0.000000e+00> : vector<32x256xf32>
    %73 = tpu.matmul %72, %56, %cst_37 {dimension_numbers = #tpu.dot_dimension_numbers<[1], [0], [0], [1], [0, 0, 1, 1], [], []>} : vector<32x8xbf16>, vector<8x256xbf16>, vector<32x256xf32> -> vector<32x256xf32>
    %c2_38 = arith.constant 2 : index
    %c0_39 = arith.constant 0 : index
    %c0_40 = arith.constant 0 : index
    %74 = vector.load %arg6[%c2_38, %c0_39, %c0_40] : memref<3x32x1xf32, #tpu.memory_space<vmem>>, vector<1x32x1xf32>
    %75 = vector.shape_cast %74 : vector<1x32x1xf32> to vector<32x1xf32>
    %76 = vector.broadcast %75 : vector<32x1xf32> to vector<32x256xf32>
    %77 = arith.addf %73, %76 : vector<32x256xf32>
    %78 = arith.truncf %63 : vector<32x128xf32> to vector<32x128xbf16>
    %79 = tpu.transpose %78, [1, 0] : vector<32x128xbf16> -> vector<128x32xbf16>
    %80 = arith.truncf %70 : vector<32x256xf32> to vector<32x256xbf16>
    %81 = arith.truncf %77 : vector<32x256xf32> to vector<32x256xbf16>
    %c0_41 = arith.constant 0 : index
    %c0_42 = arith.constant 0 : index
    %82 = vector.load %arg7[%c0_41, %c0_42] : memref<32x32xbf16, #tpu.memory_space<vmem>>, vector<32x32xbf16>
    %cst_43 = arith.constant 1.000000e+00 : bf16
    %83 = vector.broadcast %cst_43 : bf16 to vector<1x256xbf16>
    %84 = vector.extract_strided_slice %79 {offsets = [0, 0], sizes = [128, 16], strides = [1, 1]} : vector<128x32xbf16> to vector<128x16xbf16>
    %85 = vector.extract_strided_slice %80 {offsets = [0, 0], sizes = [16, 256], strides = [1, 1]} : vector<32x256xbf16> to vector<16x256xbf16>
    %cst_44 = arith.constant dense<0.000000e+00> : vector<128x256xf32>
    %86 = tpu.matmul %84, %85, %cst_44 {dimension_numbers = #tpu.dot_dimension_numbers<[1], [0], [0], [1], [0, 0, 1, 1], [], []>} : vector<128x16xbf16>, vector<16x256xbf16>, vector<128x256xf32> -> vector<128x256xf32>
    %87 = arith.truncf %86 : vector<128x256xf32> to vector<128x256xbf16>
    %c0_45 = arith.constant 0 : index
    %c0_46 = arith.constant 0 : index
    %c0_47 = arith.constant 0 : index
    %c0_48 = arith.constant 0 : index
    %88 = vector.load %arg10[%c0_45, %c0_46, %c0_47, %c0_48] : memref<1x2x128x256xbf16, #tpu.memory_space<vmem>>, vector<1x1x128x256xbf16>
    %89 = vector.shape_cast %88 : vector<1x1x128x256xbf16> to vector<128x256xbf16>
    %90 = vector.shape_cast %87 : vector<128x256xbf16> to vector<1x1x128x256xbf16>
    tpu.vector_store %arg10[%c0_45, %c0_46, %c0_47, %c0_48], %90 {strides = array<i32>} : memref<1x2x128x256xbf16, #tpu.memory_space<vmem>>, vector<1x1x128x256xbf16>,
    %cst_49 = arith.constant dense<0xFF800000> : vector<128xf32>
    %91 = vector.multi_reduction <maximumf>, %86, %cst_49 [1] : vector<128x256xf32> to vector<128xf32>
    %92 = vector.shape_cast %91 : vector<128xf32> to vector<128x1xf32>
    %93 = vector.broadcast %92 : vector<128x1xf32> to vector<128x256xf32>
    %94 = arith.subf %86, %93 : vector<128x256xf32>
    %95 = arith.truncf %94 : vector<128x256xf32> to vector<128x256xbf16>
    %96 = math.exp %95 : vector<128x256xbf16>
    %cst_50 = arith.constant dense<0.000000e+00> : vector<1x128xf32>
    %97 = tpu.matmul %83, %96, %cst_50 {dimension_numbers = #tpu.dot_dimension_numbers<[1], [1], [0], [0], [0, 0, 1, 0], [], []>} : vector<1x256xbf16>, vector<128x256xbf16>, vector<1x128xf32> -> vector<1x128xf32>
    %98 = tpu.reciprocal %97 {approx = true} : vector<1x128xf32> -> vector<1x128xf32>
    %99 = vector.extract_strided_slice %81 {offsets = [0, 0], sizes = [16, 256], strides = [1, 1]} : vector<32x256xbf16> to vector<16x256xbf16>
    %cst_51 = arith.constant dense<0.000000e+00> : vector<16x128xf32>
    %100 = tpu.matmul %99, %96, %cst_51 {dimension_numbers = #tpu.dot_dimension_numbers<[1], [1], [0], [0], [0, 0, 1, 0], [], []>} : vector<16x256xbf16>, vector<128x256xbf16>, vector<16x128xf32> -> vector<16x128xf32>
    %101 = vector.broadcast %98 : vector<1x128xf32> to vector<16x128xf32>
    %102 = arith.mulf %100, %101 : vector<16x128xf32>
    %103 = vector.extract_strided_slice %82 {offsets = [0, 0], sizes = [32, 16], strides = [1, 1]} : vector<32x32xbf16> to vector<32x16xbf16>
    %104 = arith.truncf %102 : vector<16x128xf32> to vector<16x128xbf16>
    %cst_52 = arith.constant dense<0.000000e+00> : vector<32x128xf32>
    %105 = tpu.matmul %103, %104, %cst_52 {dimension_numbers = #tpu.dot_dimension_numbers<[1], [0], [0], [1], [0, 0, 1, 1], [], []>} : vector<32x16xbf16>, vector<16x128xbf16>, vector<32x128xf32> -> vector<32x128xf32>
    %106 = vector.extract_strided_slice %79 {offsets = [0, 16], sizes = [128, 16], strides = [1, 1]} : vector<128x32xbf16> to vector<128x16xbf16>
    %107 = vector.extract_strided_slice %80 {offsets = [16, 0], sizes = [16, 256], strides = [1, 1]} : vector<32x256xbf16> to vector<16x256xbf16>
    %cst_53 = arith.constant dense<0.000000e+00> : vector<128x256xf32>
    %108 = tpu.matmul %106, %107, %cst_53 {dimension_numbers = #tpu.dot_dimension_numbers<[1], [0], [0], [1], [0, 0, 1, 1], [], []>} : vector<128x16xbf16>, vector<16x256xbf16>, vector<128x256xf32> -> vector<128x256xf32>
    %109 = arith.truncf %108 : vector<128x256xf32> to vector<128x256xbf16>
    %c0_54 = arith.constant 0 : index
    %c1_55 = arith.constant 1 : index
    %c0_56 = arith.constant 0 : index
    %c0_57 = arith.constant 0 : index
    %110 = vector.load %arg10[%c0_54, %c1_55, %c0_56, %c0_57] : memref<1x2x128x256xbf16, #tpu.memory_space<vmem>>, vector<1x1x128x256xbf16>
    %111 = vector.shape_cast %110 : vector<1x1x128x256xbf16> to vector<128x256xbf16>
    %112 = vector.shape_cast %109 : vector<128x256xbf16> to vector<1x1x128x256xbf16>
    tpu.vector_store %arg10[%c0_54, %c1_55, %c0_56, %c0_57], %112 {strides = array<i32>} : memref<1x2x128x256xbf16, #tpu.memory_space<vmem>>, vector<1x1x128x256xbf16>,
    %cst_58 = arith.constant dense<0xFF800000> : vector<128xf32>
    %113 = vector.multi_reduction <maximumf>, %108, %cst_58 [1] : vector<128x256xf32> to vector<128xf32>
    %114 = vector.shape_cast %113 : vector<128xf32> to vector<128x1xf32>
    %115 = vector.broadcast %114 : vector<128x1xf32> to vector<128x256xf32>
    %116 = arith.subf %108, %115 : vector<128x256xf32>
    %117 = arith.truncf %116 : vector<128x256xf32> to vector<128x256xbf16>
    %118 = math.exp %117 : vector<128x256xbf16>
    %cst_59 = arith.constant dense<0.000000e+00> : vector<1x128xf32>
    %119 = tpu.matmul %83, %118, %cst_59 {dimension_numbers = #tpu.dot_dimension_numbers<[1], [1], [0], [0], [0, 0, 1, 0], [], []>} : vector<1x256xbf16>, vector<128x256xbf16>, vector<1x128xf32> -> vector<1x128xf32>
    %120 = tpu.reciprocal %119 {approx = true} : vector<1x128xf32> -> vector<1x128xf32>
    %121 = vector.extract_strided_slice %81 {offsets = [16, 0], sizes = [16, 256], strides = [1, 1]} : vector<32x256xbf16> to vector<16x256xbf16>
    %cst_60 = arith.constant dense<0.000000e+00> : vector<16x128xf32>
    %122 = tpu.matmul %121, %118, %cst_60 {dimension_numbers = #tpu.dot_dimension_numbers<[1], [1], [0], [0], [0, 0, 1, 0], [], []>} : vector<16x256xbf16>, vector<128x256xbf16>, vector<16x128xf32> -> vector<16x128xf32>
    %123 = vector.broadcast %120 : vector<1x128xf32> to vector<16x128xf32>
    %124 = arith.mulf %122, %123 : vector<16x128xf32>
    %125 = vector.extract_strided_slice %82 {offsets = [0, 16], sizes = [32, 16], strides = [1, 1]} : vector<32x32xbf16> to vector<32x16xbf16>
    %126 = arith.truncf %124 : vector<16x128xf32> to vector<16x128xbf16>
    %cst_61 = arith.constant dense<0.000000e+00> : vector<32x128xf32>
    %127 = tpu.matmul %125, %126, %cst_61 {dimension_numbers = #tpu.dot_dimension_numbers<[1], [0], [0], [1], [0, 0, 1, 1], [], []>} : vector<32x16xbf16>, vector<16x128xbf16>, vector<32x128xf32> -> vector<32x128xf32>
    %128 = arith.addf %105, %127 : vector<32x128xf32>
    %c0_62 = arith.constant 0 : index
    %c0_63 = arith.constant 0 : index
    %129 = vector.load %arg8[%c0_62, %c0_63] : memref<32x1xf32, #tpu.memory_space<vmem>>, vector<32x1xf32>
    %130 = vector.broadcast %129 : vector<32x1xf32> to vector<32x128xf32>
    %131 = arith.addf %128, %130 : vector<32x128xf32>
    %c0_64 = arith.constant 0 : index
    %c0_65 = arith.constant 0 : index
    %c0_66 = arith.constant 0 : index
    %132 = vector.load %arg9[%c0_64, %c0_65, %c0_66] : memref<1x32x128xf32, #tpu.memory_space<vmem>>, vector<1x32x128xf32>
    %133 = vector.shape_cast %132 : vector<1x32x128xf32> to vector<32x128xf32>
    %134 = vector.shape_cast %131 : vector<32x128xf32> to vector<1x32x128xf32>
    tpu.vector_store %arg9[%c0_64, %c0_65, %c0_66], %134 {strides = array<i32>} : memref<1x32x128xf32, #tpu.memory_space<vmem>>, vector<1x32x128xf32>,
    return
  }
  func.func @transform_0(%arg0: i32, %arg1: i32) -> (i32, i32, i32) {
    %c0_i32 = arith.constant 0 : i32
    %c0_i32_0 = arith.constant 0 : i32
    return %arg0, %c0_i32, %arg1 : i32, i32, i32
  }
  func.func @transform_1(%arg0: i32, %arg1: i32) -> (i32, i32, i32) {
    %c0_i32 = arith.constant 0 : i32
    %c0_i32_0 = arith.constant 0 : i32
    %c0_i32_1 = arith.constant 0 : i32
    return %arg0, %c0_i32, %c0_i32_0 : i32, i32, i32
  }
  func.func @transform_2(%arg0: i32, %arg1: i32) -> (i32, i32, i32) {
    %c0_i32 = arith.constant 0 : i32
    %c0_i32_0 = arith.constant 0 : i32
    %c0_i32_1 = arith.constant 0 : i32
    return %arg0, %c0_i32, %c0_i32_0 : i32, i32, i32
  }
  func.func @transform_3(%arg0: i32, %arg1: i32) -> (i32, i32, i32) {
    %c0_i32 = arith.constant 0 : i32
    %c0_i32_0 = arith.constant 0 : i32
    %c0_i32_1 = arith.constant 0 : i32
    %c0_i32_2 = arith.constant 0 : i32
    return %c0_i32, %c0_i32_0, %c0_i32_1 : i32, i32, i32
  }
  func.func @transform_4(%arg0: i32, %arg1: i32) -> (i32, i32, i32) {
    %c0_i32 = arith.constant 0 : i32
    %c0_i32_0 = arith.constant 0 : i32
    %c0_i32_1 = arith.constant 0 : i32
    %c0_i32_2 = arith.constant 0 : i32
    return %c0_i32, %c0_i32_0, %c0_i32_1 : i32, i32, i32
  }
  func.func @transform_5(%arg0: i32, %arg1: i32) -> (i32, i32) {
    %c0_i32 = arith.constant 0 : i32
    %c0_i32_0 = arith.constant 0 : i32
    %c0_i32_1 = arith.constant 0 : i32
    return %c0_i32, %c0_i32_0 : i32, i32
  }
  func.func @transform_6(%arg0: i32, %arg1: i32) -> (i32, i32) {
    %c0_i32 = arith.constant 0 : i32
    %c0_i32_0 = arith.constant 0 : i32
    %c0_i32_1 = arith.constant 0 : i32
    return %c0_i32, %c0_i32_0 : i32, i32
  }
  func.func @transform_7(%arg0: i32, %arg1: i32) -> (i32, i32, i32) {
    %c0_i32 = arith.constant 0 : i32
    %c0_i32_0 = arith.constant 0 : i32
    return %arg0, %c0_i32, %arg1 : i32, i32, i32
  }
  func.func @transform_8(%arg0: i32, %arg1: i32) -> (i32, i32, i32, i32) {
    %c0_i32 = arith.constant 0 : i32
    %c0_i32_0 = arith.constant 0 : i32
    %c0_i32_1 = arith.constant 0 : i32
    return %arg0, %c0_i32, %arg1, %c0_i32_0 : i32, i32, i32, i32
  }
}

</mosaic_0001>

<bundles_post_ra>
// kernel: tpu_custom_call.1
= control target key start
LH: loop header
LB: loop body
LE: loop exit
PB: predicated region body
PF: predicated region fallthrough
CT: control target
= control target key end

     0   :  { %14 = vsyncpa [#allocation3], 0  ;;  %s3380_s0 = inlined_call_operand.vmem [shape: f32[2,8,128], index: 0, kind: input, shape index: {}]   ;;  %s3381_s1 = inlined_call_operand.vmem [shape: f32[2,8,256], index: 1, kind: input, shape index: {}]   ;;  %s3382_s2 = inlined_call_operand.vmem [shape: f32[2,8,256], index: 2, kind: input, shape index: {}]   ;;  %s3383_s3 = inlined_call_operand.vmem [shape: bf16[3,32,8], index: 3, kind: input, shape index: {}]   ;;  %s3384_s4 = inlined_call_operand.vmem [shape: f32[3,32,1], index: 4, kind: input, shape index: {}]   ;;  %s3385_s5 = inlined_call_operand.vmem [shape: bf16[32,32], index: 5, kind: input, shape index: {}]   ;;  %s3386_s6 = inlined_call_operand.vmem [shape: f32[32,1], index: 6, kind: input, shape index: {}]   ;;  %s3387_s7 = inlined_call_operand.hbm [shape: f32[2,32,128], index: 7, kind: output, shape index: {0}]   ;;  %s3388_s8 = inlined_call_operand.hbm [shape: bf16[2,2,128,256], index: 8, kind: output, shape index: {1}]  }
   0x1   :  { %16 = vsyncpa [#allocation3 + $0x1], 0 }
   0x2   :  { %17 = vsyncpa [#allocation5], 0 }
   0x3   :  { %19 = vsyncpa [#allocation5 + $0x1], 0  ;;  %s2642_s27 = smov 0   ;;  %s2644_s28 = smov 0  }
   0x4   :  { %s2646_s29 = smov 0   ;;  %s2648_s30 = smov 0  }
   0x5   :  { %s2650_s9 = smov 0   ;;  %s2652_s10 = smov 0  }
   0x6 LB: > { %3394 = sst [smem:[#allocation8_spill]] %s2584_s9  ;;  %s2145_s11 = sadd.s32 4294967295, %s2588_s10   ;;  %s2588_s10 = sphi %s2652_s10, %s25_s10   ;;  %s2584_s9 = sphi %s2650_s9, %s3410_s9   ;;  %s2580_s30 = sphi %s2648_s30, %s3409_s30   ;;  %s2576_s29 = sphi %s2646_s29, %s3413_s29   ;;  %s2572_s28 = sphi %s2644_s28, %s3412_s28   ;;  %s2568_s27 = sphi %s2642_s27, %s3411_s27  }
   0x7   : > { %s2146_s12 = sadd.s32 4294967294, %s2588_s10   ;;  %s37_s13 = sadd.s32 1, %s2584_s9 }
   0x8   : > { %s210_s14 = sadd.s32 1, %s2576_s29  ;;  %p39_p0 = scmp.ge.s32.totalorder %s37_s13, 2 }
   0x9   : > { %p220_p1 = scmp.ne.s32.totalorder %s2576_s29, %s2572_s28  ;;  %p221_p2 = scmp.eq.s32.totalorder %s2145_s11, 1 }
   0xa   : > { %p226_p3 = scmp.ne.s32.totalorder %s2572_s28, %s2568_s27  ;;  %s3415_s13 = smov (%p39_p0, %s37_s13), 0 }
   0xb   : > { %3395 = sst [smem:[#allocation9_spill]] %s3415_s13  ;;  %p2682_p4 = por %p221_p2, %p220_p1 }
   0xc   : > { %p227_p5 = scmp.eq.s32.totalorder %s2146_s12, 1  ;;  %s205_s16 = ssub.s32 %s2584_s9, %s3415_s13 }
   0xd   : > { %p2149_p6 = scmp.ge.s32.totalorder %s2588_s10, 1  ;;  %p208_p7 = scmp.eq.s32.totalorder %s205_s16, 0 }
   0xe   : > { %p2689_p8 = por %p227_p5, %p226_p3  ;;  %p311_p9 = scmp.lt.s32.totalorder %s2588_s10, 3 }
   0xf   : > { %s2695_s18 = scalar_select %p208_p7, %s2576_s29, %s210_s14  }
  0x10   : > { %p312_p10 = pnand %p2149_p6, %p311_p9 }
  0x12   : > { %315 = sbr.rel (%p312_p10) target bundleno = 1804 (0x70c), region = 48 }
  0x17   : > { %p362_p11 = scmp.lt.s32.totalorder %s2580_s30, 1  ;;  %v2396_v0 = vld [vmem:[%s3383_s3] sm:$0xff]   ;;  %vm526_vm0 = vcmask 64512   ;;  %v2590_v1 = vmov 0   ;;  %v494_v3 = vld [vmem:[%s3384_s4 + $0x10] sm:$0xff]  ;;  %v493_v4 = vld [vmem:[%s3384_s4 + $0x8] sm:$0xff] }
  0x18   : > { %670 = vmatprep.mubr.bf16.mxu1 %v2590_v1  ;;  %2394 = vset.pattern.permute.xlu0 %v2590_v1  ;;  %v492_v2 = vld [vmem:[%s3384_s4] sm:$0xff]  ;;  %v495_v5 = vld [vmem:[%s3384_s4 + $0x18] sm:$0xff]  ;;  %v2166_v13 = vld [vmem:[%s3384_s4 + $0x28] sm:$0xff]  ;;  %vm533_vm1 = vcmask 1043456   ;;  %vm826_vm2 = vcmask 130048   ;;  %s2801_s23 = sand.u32 1, %s2572_s28  }
  0x19   : > { %s2702_s21 = scalar_select %p362_p11, %s2580_s30, 1  ;;  %2312 = vmatprep.mubr.msk.bf16.mxu0 %vm526_vm0, %v2396_v0  ;;  %2395 = vset.pattern.permute.xlu1 %v2590_v1  ;;  %v2165_v12 = vld [vmem:[%s3384_s4 + $0x20] sm:$0xff] }
  0x1a   : > { %498 = vperm.xlu0 %2394, %v492_v2   ;;  %508 = vperm.xlu1 %2395, %v494_v3   ;;  %s2151_s24 = sshll.u32 %s2801_s23, 8  ;;  %s2591_s16 = smov 112  }
  0x1b   : > { %s2152_s26 = sshll.u32 %s2702_s21, 3  ;;  %s2265_s11 = sshll.u32 %s2702_s21, 4 }
  0x1c   : > { %s368_s20 = scalar_lea.vmem %s3380_s0, %s2152_s26  ;;  %s373_s13 = scalar_lea.vmem %s3381_s1, %s2265_s11 }
  0x1d   : > { %v382_v6 = vld [vmem:[%s368_s20] sm:$0xff]  ;;  %v405_v7 = vld [vmem:[%s373_s13 + $0x8] sm:$0xff]  ;;  %s2814_s25 = scalar_lea.vmem [#allocation4], %s2151_s24  ;;  %s378_s14 = scalar_lea.vmem %s3382_s2, %s2265_s11 }
  0x1e   : > { %v404_v8 = vld [vmem:[%s373_s13] sm:$0xff]  ;;  %v383_v9 = vrot.slane %v382_v6, 4  ;;  %v412_v10 = vrot.slane %v405_v7, 4  ;;  %503 = vperm.xlu0 %2394, %v493_v4   ;;  %513 = vperm.xlu1 %2395, %v495_v5   ;;  %s2011_s26 = sshll.u32 %s2814_s25, 4  ;;  %s2593_s11 = smov [#allocation4]   ;;  %s3297_s26 = int_to_ptr.vmem [resolvable:$true] %s2011_s26 }
  0x1f   : > { %v406_v11 = vrot.slane %v404_v8, 4  ;;  %s2482_s21 = scalar_lea.vmem %s3297_s26, 4096  ;;  %s2486_s9 = sshll.u32 %s2593_s11, 4  ;;  %s2487_s9 = int_to_ptr.vmem [resolvable:$false] %s2486_s9 }
  0x20   : > { %v384_v14 = vadd.f32 %v383_v9, %v382_v6  ;;  %v413_v15 = vadd.f32 %v412_v10, %v405_v7  ;;  %v2397_v9 = vld [vmem:[%s3383_s3 + $0x8] sm:$0xff]   ;;  %p2483_p12 = scmp.ne.s32.totalorder %s3297_s26, %s2482_s21  ;;  %s2488_s13 = scalar_lea.vmem %s2487_s9, 8192 }
  0x21   : > { %v407_v16 = vadd.f32 %v406_v11, %v404_v8  ;;  %v2398_v11 = vld [vmem:[%s3383_s3 + $0x10] sm:$0xff]   ;;  %p2489_p1 = scmp.lt.s32.totalorder %s3297_s26, %s2487_s9  ;;  %p2490_p2 = scmp.lt.s32.totalorder %s2488_s13, %s2482_s21 }
  0x22   : > { %v385_v17 = vrot.slane %v384_v14, 2  ;;  %v414_v18 = vrot.slane %v413_v15, 2  ;;  %598 = vperm.xlu0 %2394, %v2165_v12   ;;  %603 = vperm.xlu1 %2395, %v2166_v13   ;;  %v2399_v12 = vld [vmem:[%s3383_s3 + $0x18] sm:$0xff]   ;;  %p2484_p13 = pnand %p2483_p12, %p2682_p4 }
  0x23   : > { %v408_v19 = vrot.slane %v407_v16, 2  ;;  %p2491_p3 = por %p2490_p2, %p2489_p1 }
  0x24   : > { %v386_v20 = vadd.f32 %v385_v17, %v384_v14  ;;  %v415_v21 = vadd.f32 %v414_v18, %v413_v15  ;;  %p2485_p0 = pneg %p2484_p13 }
  0x25   : > { %v409_v22 = vadd.f32 %v408_v19, %v407_v16 }
  0x26   : > { %v387_v23 = vrot.slane %v386_v20, 1  ;;  %v416_v24 = vrot.slane %v415_v21, 1  ;;  %p2492_p5 = pnand %p2491_p3, %p2485_p0 }
  0x27   : > { %v410_v25 = vrot.slane %v409_v22, 1 }
  0x28   : > { %v388_v26 = vadd.f32 %v387_v23, %v386_v20  ;;  %v417_v27 = vadd.f32 %v416_v24, %v415_v21 }
  0x29   : > { %v411_v28 = vadd.f32 %v410_v25, %v409_v22 }
  0x2a   : > { %v390_v29 = vmul.f32 0.125, %v388_v26  ;;  %v419_v30 = vmul.f32 0.125, %v417_v27 }
  0x2b   : > { %v418_v31 = vmul.f32 0.125, %v411_v28 }
  0x2c   : > { %v391_v32 = vsub.f32 %v382_v6, %v390_v29  ;;  %v421_v33 = vsub.f32 %v405_v7, %v419_v30 }
  0x2d   : > { %v420_v34 = vsub.f32 %v404_v8, %v418_v31 }
  0x2e   : > { %v392_v35 = vmul.f32 %v391_v32, %v391_v32  ;;  %v423_v36 = vmul.f32 %v421_v33, %v421_v33 }
  0x2f   : > { %v422_v37 = vmul.f32 %v420_v34, %v420_v34 }
  0x30   : > { %v393_v38 = vrot.slane %v392_v35, 4  ;;  %v430_v39 = vrot.slane %v423_v36, 4 }
  0x31   : > { %v424_v40 = vrot.slane %v422_v37, 4 }
  0x32   : > { %v394_v41 = vadd.f32 %v393_v38, %v392_v35  ;;  %v431_v42 = vadd.f32 %v430_v39, %v423_v36 }
  0x33   : > { %v425_v43 = vadd.f32 %v424_v40, %v422_v37 }
  0x34   : > { %v395_v44 = vrot.slane %v394_v41, 2  ;;  %v432_v45 = vrot.slane %v431_v42, 2 }
  0x35   : > { %v426_v46 = vrot.slane %v425_v43, 2 }
  0x36   : > { %v396_v47 = vadd.f32 %v395_v44, %v394_v41  ;;  %v433_v48 = vadd.f32 %v432_v45, %v431_v42 }
  0x37   : > { %v427_v49 = vadd.f32 %v426_v46, %v425_v43 }
  0x38   : > { %v397_v50 = vrot.slane %v396_v47, 1  ;;  %v434_v51 = vrot.slane %v433_v48, 1 }
  0x39   : > { %v428_v52 = vrot.slane %v427_v49, 1 }
  0x3a   : > { %v398_v53 = vadd.f32 %v397_v50, %v396_v47  ;;  %v435_v54 = vadd.f32 %v434_v51, %v433_v48 }
  0x3b   : > { %v429_v55 = vadd.f32 %v428_v52, %v427_v49 }
  0x3c   : > { %v399_v56 = vmul.f32 0.125, %v398_v53  ;;  %v437_v57 = vmul.f32 0.125, %v435_v54 }
  0x3d   : > { %v436_v58 = vmul.f32 0.125, %v429_v55 }
  0x3e   : > { %v400_v59 = vadd.f32 1e-05, %v399_v56  ;;  %v439_v60 = vadd.f32 1e-05, %v437_v57 }
  0x3f   : > { %v438_v61 = vadd.f32 1e-05, %v436_v58 }
  0x40   : > { %2404 = vrsqrt.f32 %v400_v59 }
  0x41   : > { %2406 = vrsqrt.f32 %v439_v60 }
  0x42   : > { %2408 = vrsqrt.f32 %v438_v61 }
  0x4d   : > { %v2405_v62 = vpop.eup %2404 }
  0x4e   : > { %v2407_v63 = vpop.eup %2406  ;;  %v402_v0 = vmul.f32 %v2405_v62, %v391_v32 }
  0x4f   : > { %v2409_v2 = vpop.eup %2408  ;;  %v443_v3 = vmul.f32 %v2407_v63, %v421_v33 }
  0x50   : > { %v403_v4 = vpack.c.bf16 %v402_v0, %v402_v0  ;;  %v442_v5 = vmul.f32 %v2409_v2, %v420_v34 }
  0x51   : > { %v445_v6 = vpack.c.bf16 %v443_v3, %v443_v3 }
  0x52   : > { %2328 = vmatprep.subr.msk.bf16.mxu0 %vm533_vm1, %v403_v4  ;;  %v535_v7 = vsel %vm533_vm1, %v403_v4, 0  ;;  %v444_v8 = vpack.c.bf16 %v442_v5, %v442_v5 }
  0x53   : > { %2171 = vmatprep.subr.msk.bf16.mxu1 %vm533_vm1, %v445_v6  ;;  %2311 = vmatpush3.bf16.msra.mxu0 %v535_v7 }
  0x54   : > { %v633_v10 = vsel %vm533_vm1, %v444_v8, 0 }
  0x55   : > { %653 = vmatpush1.bf16.msra.mxu1 %v633_v10 }
  0x56   : > { %2313 = vmatmul.mubr.msk.bf16.vlgmr.msra.gmra.mxu0 %vm526_vm0, %v2397_v9  ;;  %v447_v9 = vld [vmem:[%s378_s14 + $0x8] sm:$0xff] }
  0x57   : > { %775 = vmatprep.mubr.bf16.mxu0 %v2590_v1 }
  0x58   : > { %2172 = vmatmul.mubr.msk.bf16.vlgmr.msra.gmra.mxu1 %vm526_vm0, %v2398_v11 }
  0x59   : > { %680 = vmatprep.mubr.bf16.mxu1 %v2590_v1 }
  0x60   : > { %2173 = vmatmul.mubr.msk.bf16.gmra.mxu1 %vm526_vm0, %v2399_v12  ;;  %v454_v12 = vrot.slane %v447_v9, 4 }
  0x61   : > { %883 = vmatprep.mubr.bf16.mxu1 %v2590_v1 }
  0x95   : > { %v499_v13 = vpop.permute.xlu0 %498  ;;  %v509_v14 = vpop.permute.xlu1 %508 }
  0x99   : > { %v504_v15 = vpop.permute.xlu0 %503  ;;  %v514_v16 = vpop.permute.xlu1 %513 }
  0x9d   : > { %v599_v22 = vpop.permute.xlu0 %598  ;;  %v604_v23 = vpop.permute.xlu1 %603 }
 0x116   : > { %v2314_v17 = vpop.f32.mrf.mxu0 }
 0x117   : > { %v580_v35 = vadd.f32 %v2314_v17, %v509_v14 }
 0x118   : > { %v672_v18 = vpop.f32.mrf.mxu1  ;;  %v571_v19 = vpop.f32.mrf.mxu0 }
 0x119   : > { %v572_v26 = vadd.f32 %v571_v19, %v499_v13  ;;  %v673_v34 = vadd.f32 %v672_v18, %v599_v22  ;;  %v446_v19 = vld [vmem:[%s378_s14] sm:$0xff]  ;;  %s1978_s14 = scalar_lea.sflag [#allocation5], %s2801_s23 }
 0x11a   : > { %v674_v20 = vpop.f32.mrf.mxu1  ;;  %v2315_v21 = vpop.f32.mrf.mxu0 }
 0x11b   : > { %v675_v30 = vadd.f32 %v674_v20, %v599_v22  ;;  %v583_v31 = vadd.f32 %v2315_v21, %v514_v16  ;;  %v455_v16 = vadd.f32 %v454_v12, %v447_v9  ;;  %v448_v20 = vrot.slane %v446_v19, 4 }
 0x11c   : > { %v676_v24 = vpop.f32.mrf.mxu1  ;;  %v574_v25 = vpop.f32.mrf.mxu0 }
 0x11d   : > { %v575_v27 = vadd.f32 %v574_v25, %v504_v15  ;;  %v677_v28 = vadd.f32 %v676_v24, %v604_v23  ;;  %v797_v38 = vpack.c.bf16 %v583_v31, %v580_v35  ;;  %v456_v22 = vrot.slane %v455_v16, 2 }
 0x11e   : > { %v678_v29 = vpop.f32.mrf.mxu1  ;;  %v449_v24 = vadd.f32 %v448_v20, %v446_v19 }
 0x11f   : > { %v796_v32 = vpack.c.bf16 %v575_v27, %v572_v26  ;;  %v679_v33 = vadd.f32 %v678_v29, %v604_v23  ;;  %v814_v37 = vpack.c.bf16 %v677_v28, %v673_v34  ;;  %v457_v29 = vadd.f32 %v456_v22, %v455_v16 }
 0x120   : > { %v2794_v47 = vpop.f32.mrf.mxu1  ;;  %v450_v26 = vrot.slane %v449_v24, 2 }
 0x121   : > { %v815_v36 = vpack.c.bf16 %v679_v33, %v675_v30  ;;  %798 = vxpose.xlu0.c.b16.start [1/2] (short) %v796_v32, 128  ;;  %v458_v32 = vrot.slane %v457_v29, 1 }
 0x122   : > { %v2796_v48 = vpop.f32.mrf.mxu1  ;;  %v451_v30 = vadd.f32 %v450_v26, %v449_v24 }
 0x123   : > { %865 = vmatprep.subr.bf16.mxu1 %v815_v36  ;;  %v459_v36 = vadd.f32 %v458_v32, %v457_v29 }
 0x124   : > { %866 = vmatpush1.bf16.msra.mxu1 %v814_v37  ;;  %v2798_v49 = vpop.f32.mrf.mxu1  ;;  %v452_v33 = vrot.slane %v451_v30, 1 }
 0x125   : > { %799 = vxpose.xlu0.c.b16.end [2/2] (short) %v797_v38, 128 }
 0x126   : > { %v2803_v50 = vpop.f32.mrf.mxu1  ;;  %v453_v37 = vadd.f32 %v452_v33, %v451_v30 }
 0x183   : > { %v2755_v39 = vpop.trf.xlu0 }
 0x184   : > { %2187 = vmatmul.mubr.msk.bf16.vlgmr.msra.gmra.mxu1 %vm826_vm2, %v2755_v39 }
 0x185   : > { %893 = vmatprep.mubr.bf16.mxu1 %v2590_v1 }
 0x187   : > { %v2760_v40 = vpop.trf.xlu0 }
 0x18b   : > { %v2765_v41 = vpop.trf.xlu0 }
 0x18c   : > { %2188 = vmatmul.mubr.msk.bf16.gmra.mxu1 %vm826_vm2, %v2760_v40 }
 0x18d   : > { %903 = vmatprep.mubr.bf16.mxu1 %v2590_v1 }
 0x18f   : > { %v2770_v42 = vpop.trf.xlu0 }
 0x193   : > { %v2775_v43 = vpop.trf.xlu0 }
 0x194   : > { %2189 = vmatmul.mubr.msk.bf16.gmra.mxu1 %vm826_vm2, %v2765_v41 }
 0x195   : > { %913 = vmatprep.mubr.bf16.mxu1 %v2590_v1 }
 0x197   : > { %v2780_v44 = vpop.trf.xlu0 }
 0x19b   : > { %v2785_v45 = vpop.trf.xlu0 }
 0x19c   : > { %2190 = vmatmul.mubr.msk.bf16.gmra.mxu1 %vm826_vm2, %v2770_v42 }
 0x19d   : > { %923 = vmatprep.mubr.bf16.mxu1 %v2590_v1 }
 0x19f   : > { %v2790_v46 = vpop.trf.xlu0 }
 0x1a4   : > { %2191 = vmatmul.mubr.msk.bf16.gmra.mxu1 %vm826_vm2, %v2775_v43 }
 0x1a5   : > { %933 = vmatprep.mubr.bf16.mxu1 %v2590_v1 }
 0x1ac   : > { %2192 = vmatmul.mubr.msk.bf16.gmra.mxu1 %vm826_vm2, %v2780_v44 }
 0x1ad   : > { %943 = vmatprep.mubr.bf16.mxu1 %v2590_v1 }
 0x1b4   : > { %2193 = vmatmul.mubr.msk.bf16.gmra.mxu1 %vm826_vm2, %v2785_v45 }
 0x1b5   : > { %953 = vmatprep.mubr.bf16.mxu1 %v2590_v1 }
 0x1bc   : > { %2194 = vmatmul.mubr.msk.bf16.gmra.mxu1 %vm826_vm2, %v2790_v46 }
 0x244   : > { %v2806_v51 = vpop.f32.mrf.mxu1 }
 0x246   : > { %v2808_v52 = vpop.f32.mrf.mxu1 }
 0x247   : > { %v2267_v53 = vpack.c.bf16 %v2808_v52, %v2806_v51 }
 0x248   : > { %v2812_v54 = vpop.f32.mrf.mxu1 }
 0x249   : > { %1060 = vst [vmem:[%s2814_s25] sm:$0xff] %v2267_v53  ;;  %v461_v53 = vmul.f32 0.125, %v459_v36 }
 0x24a   : > { %v2817_v55 = vpop.f32.mrf.mxu1 }
 0x24b   : > { %v2268_v56 = vpack.c.bf16 %v2817_v55, %v2812_v54 }
 0x24c   : > { %v2821_v57 = vpop.f32.mrf.mxu1 }
 0x24d   : > { %1061 = vst [vmem:[%s2814_s25 + $0x8] sm:$0xff] %v2268_v56  ;;  %v460_v56 = vmul.f32 0.125, %v453_v37 }
 0x24e   : > { %v2824_v58 = vpop.f32.mrf.mxu1 }
 0x24f   : > { %v2269_v59 = vpack.c.bf16 %v2824_v58, %v2821_v57 }
 0x250   : > { %v2828_v60 = vpop.f32.mrf.mxu1 }
 0x251   : > { %1062 = vst [vmem:[%s2814_s25 + $0x10] sm:$0xff] %v2269_v59 }
 0x252   : > { %v2831_v61 = vpop.f32.mrf.mxu1 }
 0x253   : > { %v2270_v62 = vpack.c.bf16 %v2831_v61, %v2828_v60 }
 0x254   : > { %v2835_v63 = vpop.f32.mrf.mxu1 }
 0x255   : > { %1063 = vst [vmem:[%s2814_s25 + $0x18] sm:$0xff] %v2270_v62 }
 0x256   : > { %v2838_v0 = vpop.f32.mrf.mxu1 }
 0x257   : > { %v2271_v2 = vpack.c.bf16 %v2838_v0, %v2835_v63 }
 0x258   : > { %v2842_v3 = vpop.f32.mrf.mxu1 }
 0x259   : > { %1064 = vst [vmem:[%s2814_s25 + $0x20] sm:$0xff] %v2271_v2  ;;  %v463_v2 = vsub.f32 %v447_v9, %v461_v53 }
 0x25a   : > { %v2845_v4 = vpop.f32.mrf.mxu1 }
 0x25b   : > { %v2272_v5 = vpack.c.bf16 %v2845_v4, %v2842_v3  ;;  %v465_v12 = vmul.f32 %v463_v2, %v463_v2 }
 0x25c   : > { %v2849_v6 = vpop.f32.mrf.mxu1 }
 0x25d   : > { %1065 = vst [vmem:[%s2814_s25 + $0x28] sm:$0xff] %v2272_v5  ;;  %v462_v5 = vsub.f32 %v446_v19, %v460_v56  ;;  %v472_v20 = vrot.slane %v465_v12, 4 }
 0x25e   : > { %v2857_v7 = vpop.f32.mrf.mxu1 }
 0x25f   : > { %v2273_v8 = vpack.c.bf16 %v2857_v7, %v2849_v6  ;;  %v473_v24 = vadd.f32 %v472_v20, %v465_v12 }
 0x260   : > { %v2861_v10 = vpop.f32.mrf.mxu1 }
 0x261   : > { %1066 = vst [vmem:[%s2814_s25 + $0x30] sm:$0xff] %v2273_v8  ;;  %v474_v29 = vrot.slane %v473_v24, 2 }
 0x262   : > { %v2864_v11 = vpop.f32.mrf.mxu1 }
 0x263   : > { %v2274_v13 = vpack.c.bf16 %v2864_v11, %v2861_v10  ;;  %v475_v33 = vadd.f32 %v474_v29, %v473_v24 }
 0x264   : > { %v2868_v14 = vpop.f32.mrf.mxu1 }
 0x265   : > { %1067 = vst [vmem:[%s2814_s25 + $0x38] sm:$0xff] %v2274_v13  ;;  %v464_v13 = vmul.f32 %v462_v5, %v462_v5 }
 0x266   : > { %v2871_v15 = vpop.f32.mrf.mxu1 }
 0x267   : > { %v2275_v17 = vpack.c.bf16 %v2871_v15, %v2868_v14  ;;  %v466_v22 = vrot.slane %v464_v13, 4 }
 0x268   : > { %v2875_v18 = vpop.f32.mrf.mxu1 }
 0x269   : > { %1068 = vst [vmem:[%s2814_s25 + $0x40] sm:$0xff] %v2275_v17  ;;  %v467_v26 = vadd.f32 %v466_v22, %v464_v13  ;;  %v1091_v22 = vmax.f32 %v2842_v3, %v2845_v4 }
 0x26a   : > { %v2878_v21 = vpop.f32.mrf.mxu1 }
 0x26b   : > { %v2276_v23 = vpack.c.bf16 %v2878_v21, %v2875_v18  ;;  %v468_v30 = vrot.slane %v467_v26, 2 }
 0x26c   : > { %v2882_v25 = vpop.f32.mrf.mxu1 }
 0x26d   : > { %1069 = vst [vmem:[%s2814_s25 + $0x48] sm:$0xff] %v2276_v23 }
 0x26e   : > { %v2885_v27 = vpop.f32.mrf.mxu1 }
 0x26f   : > { %v2277_v28 = vpack.c.bf16 %v2885_v27, %v2882_v25  ;;  %v1106_v29 = vmax.f32 %v2882_v25, %v2885_v27 }
 0x270   : > { %v2889_v31 = vpop.f32.mrf.mxu1 }
 0x271   : > { %1070 = vst [vmem:[%s2814_s25 + $0x50] sm:$0xff] %v2277_v28 }
 0x272   : > { %v2892_v34 = vpop.f32.mrf.mxu1 }
 0x273   : > { %v2278_v35 = vpack.c.bf16 %v2892_v34, %v2889_v31 }
 0x274   : > { %v2896_v38 = vpop.f32.mrf.mxu1 }
 0x275   : > { %1071 = vst [vmem:[%s2814_s25 + $0x58] sm:$0xff] %v2278_v35  ;;  %v469_v35 = vadd.f32 %v468_v30, %v467_v26  ;;  %v1085_v30 = vmax.f32 %v2828_v60, %v2831_v61 }
 0x276   : > { %v2899_v59 = vpop.f32.mrf.mxu1 }
 0x277   : > { %v2279_v62 = vpack.c.bf16 %v2899_v59, %v2896_v38  ;;  %v1112_v37 = vmax.f32 %v2896_v38, %v2899_v59  ;;  %v470_v12 = vrot.slane %v469_v35, 1 }
 0x278   : > { %v2903_v8 = vpop.f32.mrf.mxu1 }
 0x279   : > { %1072 = vst [vmem:[%s2814_s25 + $0x60] sm:$0xff] %v2279_v62  ;;  %v476_v62 = vrot.slane %v475_v33, 1 }
 0x27a   : > { %v2906_v16 = vpop.f32.mrf.mxu1 }
 0x27b   : > { %v2280_v17 = vpack.c.bf16 %v2906_v16, %v2903_v8  ;;  %v477_v13 = vadd.f32 %v476_v62, %v475_v33  ;;  %v1115_v20 = vmax.f32 %v2903_v8, %v2906_v16  ;;  %v1109_v33 = vmax.f32 %v2889_v31, %v2892_v34 }
 0x27c   : > { %v2910_v23 = vpop.f32.mrf.mxu1 }
 0x27d   : > { %1073 = vst [vmem:[%s2814_s25 + $0x68] sm:$0xff] %v2280_v17  ;;  %v471_v17 = vadd.f32 %v470_v12, %v469_v35  ;;  %v479_v24 = vmul.f32 0.125, %v477_v13  ;;  %v1079_v35 = vmax.f32 %v2812_v54, %v2817_v55 }
 0x27e   : > { %v2913_v9 = vpop.f32.mrf.mxu1 }
 0x27f   : > { %v2281_v19 = vpack.c.bf16 %v2913_v9, %v2910_v23  ;;  %v1118_v28 = vmax.f32 %v2910_v23, %v2913_v9  ;;  %v478_v26 = vmul.f32 0.125, %v471_v17  ;;  %v1094_v17 = vmax.f32 %v2849_v6, %v2857_v7 }
 0x280   : > { %v2919_v32 = vpop.f32.mrf.mxu1 }
 0x281   : > { %1074 = vst [vmem:[%s2814_s25 + $0x70] sm:$0xff] %v2281_v19  ;;  %1119 = vmax.xlane.f32.xlu1 %v1118_v28  ;;  %v481_v19 = vadd.f32 1e-05, %v479_v24  ;;  %v480_v28 = vadd.f32 1e-05, %v478_v26  ;;  %v1097_v26 = vmax.f32 %v2861_v10, %v2864_v11 }
 0x282   : > { %v2922_v36 = vpop.f32.mrf.mxu1 }
 0x283   : > { %v2282_v53 = vpack.c.bf16 %v2922_v36, %v2919_v32  ;;  %v1121_v56 = vmax.f32 %v2919_v32, %v2922_v36  ;;  %2410 = vrsqrt.f32 %v481_v19  ;;  %v2400_v19 = vld [vmem:[%s3383_s3 + $0x20] sm:$0xff]  }
 0x284   : > { %2412 = vrsqrt.f32 %v480_v28  ;;  %v1082_v28 = vmax.f32 %v2821_v57, %v2824_v58 }
 0x285   : > { %1075 = vst [vmem:[%s2814_s25 + $0x78] sm:$0xff] %v2282_v53  ;;  %1113 = vmax.xlane.f32.xlu1 %v1112_v37  ;;  %1122 = vmax.xlane.f32.xlu0 %v1121_v56  ;;  %v1100_v37 = vmax.f32 %v2868_v14, %v2871_v15  ;;  %v1103_v53 = vmax.f32 %v2875_v18, %v2878_v21 }
 0x289   : > { %1116 = vmax.xlane.f32.xlu1 %v1115_v20  ;;  %1092 = vmax.xlane.f32.xlu0 %v1091_v22 }
 0x28d   : > { %1107 = vmax.xlane.f32.xlu1 %v1106_v29  ;;  %1086 = vmax.xlane.f32.xlu0 %v1085_v30  ;;  %v1076_v29 = vmax.f32 %v2806_v51, %v2808_v52  ;;  %v2167_v30 = vld [vmem:[%s3384_s4 + $0x30] sm:$0xff] }
 0x290   : > { %v2411_v56 = vpop.eup %2410 }
 0x291   : > { %1110 = vmax.xlane.f32.xlu1 %v1109_v33  ;;  %1080 = vmax.xlane.f32.xlu0 %v1079_v35  ;;  %v2413_v62 = vpop.eup %2412  ;;  %v485_v12 = vmul.f32 %v2411_v56, %v463_v2  ;;  %v1088_v2 = vmax.f32 %v2835_v63, %v2838_v0 }
 0x292   : > { %v484_v13 = vmul.f32 %v2413_v62, %v462_v5  ;;  %v2168_v5 = vld [vmem:[%s3384_s4 + $0x38] sm:$0xff] }
 0x293   : > { %v487_v20 = vpack.c.bf16 %v485_v12, %v485_v12 }
 0x294   : > { %v486_v22 = vpack.c.bf16 %v484_v13, %v484_v13 }
 0x295   : > { %1101 = vmax.xlane.f32.xlu1 %v1100_v37  ;;  %2184 = vmatprep.subr.msk.bf16.mxu0 %vm533_vm1, %v487_v20 }
 0x296   : > { %v738_v24 = vsel %vm533_vm1, %v486_v22, 0 }
 0x297   : > { %758 = vmatpush1.bf16.msra.mxu0 %v738_v24 }
 0x299   : > { %1104 = vmax.xlane.f32.xlu1 %v1103_v53 }
 0x29a   : > { %2185 = vmatmul.mubr.msk.bf16.vlgmr.msra.gmra.mxu0 %vm526_vm0, %v2400_v19 }
 0x29b   : > { %785 = vmatprep.mubr.bf16.mxu0 %v2590_v1 }
 0x29d   : > { %1095 = vmax.xlane.f32.xlu1 %v1094_v17 }
 0x2a1   : > { %1098 = vmax.xlane.f32.xlu1 %v1097_v26 }
 0x2a5   : > { %1089 = vmax.xlane.f32.xlu1 %v1088_v2 }
 0x2a7   : > { %613 = vperm.xlu0 %2394, %v2168_v5  }
 0x2a9   : > { %1083 = vmax.xlane.f32.xlu1 %v1082_v28 }
 0x2ab   : > { %1321 = vrot.lane.b32.xlu0 %v2765_v41, %s2591_s16  ;;  %v2401_v41 = vld [vmem:[%s3383_s3 + $0x28] sm:$0xff]  }
 0x2ac   : > { %2186 = vmatmul.mubr.msk.bf16.gmra.mxu0 %vm526_vm0, %v2401_v41 }
 0x2ad   : > { %1077 = vmax.xlane.f32.xlu1 %v1076_v29 }
 0x2af   : > { %1325 = vrot.lane.b32.xlu0 %v2775_v43, %s2591_s16  ;;  %v3391_v43 = vmov 1065369472  }
 0x2b0   : > { %1252 = vmatprep.mubr.bf16.mxu0 %v3391_v43 }
 0x2b3   : > { %1329 = vrot.lane.b32.xlu0 %v2785_v45, %s2591_s16 }
 0x2be   : > { %608 = vperm.xlu1 %2395, %v2167_v30  }
 0x2c2   : > { %1317 = vrot.lane.b32.xlu1 %v2755_v39, %s2591_s16 }
 0x2c6   : > { %1319 = vrot.lane.b32.xlu1 %v2760_v40, %s2591_s16 }
 0x2ca   : > { %1323 = vrot.lane.b32.xlu1 %v2770_v42, %s2591_s16 }
 0x2ce   : > { %1327 = vrot.lane.b32.xlu1 %v2780_v44, %s2591_s16 }
 0x2d2   : > { %1331 = vrot.lane.b32.xlu1 %v2790_v46, %s2591_s16 }
 0x30a   : > { %v1120_v39 = vpop.xlane.xlu1 %1119 }
 0x30b   : > { %v1152_v42 = vsub.f32 %v2910_v23, %v1120_v39  ;;  %v1153_v33 = vsub.f32 %v2913_v9, %v1120_v39 }
 0x30e   : > { %v1114_v40 = vpop.xlane.xlu1 %1113  ;;  %v1123_v45 = vpop.xlane.xlu0 %1122 }
 0x30f   : > { %v1154_v44 = vsub.f32 %v2919_v32, %v1123_v45  ;;  %v1155_v46 = vsub.f32 %v2922_v36, %v1123_v45  ;;  %v1149_v53 = vsub.f32 %v2899_v59, %v1114_v40  ;;  %v1148_v20 = vsub.f32 %v2896_v38, %v1114_v40 }
 0x311   : > { %v1170_v35 = vpack.c.bf16 %v1154_v44, %v1152_v42  ;;  %v1171_v37 = vpack.c.bf16 %v1155_v46, %v1153_v33 }
 0x312   : > { %v1117_v56 = vpop.xlane.xlu1 %1116 }
 0x313   : > { %v1215_v62 = vmul.bf16 1069105081, %v1170_v35  ;;  %v1218_v12 = vmul.bf16 1069105081, %v1171_v37  ;;  %v1150_v13 = vsub.f32 %v2903_v8, %v1117_v56  ;;  %v1151_v17 = vsub.f32 %v2906_v16, %v1117_v56 }
 0x315   : > { %2414 = vpow.bf16 %v1215_v62  ;;  %v1169_v23 = vpack.c.bf16 %v1151_v17, %v1149_v53  ;;  %v1168_v32 = vpack.c.bf16 %v1150_v13, %v1148_v20 }
 0x316   : > { %2416 = vpow.bf16 %v1218_v12  ;;  %v1108_v9 = vpop.xlane.xlu1 %1107 }
 0x317   : > { %v1212_v22 = vmul.bf16 1069105081, %v1169_v23  ;;  %v1209_v24 = vmul.bf16 1069105081, %v1168_v32  ;;  %v1145_v59 = vsub.f32 %v2885_v27, %v1108_v9  ;;  %v1144_v8 = vsub.f32 %v2882_v25, %v1108_v9 }
 0x319   : > { %2418 = vpow.bf16 %v1212_v22 }
 0x31a   : > { %v1111_v36 = vpop.xlane.xlu1 %1110  ;;  %2420 = vpow.bf16 %v1209_v24 }
 0x31b   : > { %v1146_v26 = vsub.f32 %v2889_v31, %v1111_v36  ;;  %v1147_v19 = vsub.f32 %v2892_v34, %v1111_v36 }
 0x31d   : > { %v1167_v16 = vpack.c.bf16 %v1147_v19, %v1145_v59  ;;  %v1166_v38 = vpack.c.bf16 %v1146_v26, %v1144_v8 }
 0x31e   : > { %v1102_v2 = vpop.xlane.xlu1 %1101 }
 0x31f   : > { %v1206_v5 = vmul.bf16 1069105081, %v1167_v16  ;;  %v1203_v30 = vmul.bf16 1069105081, %v1166_v38  ;;  %v1141_v41 = vsub.f32 %v2871_v15, %v1102_v2  ;;  %v1140_v34 = vsub.f32 %v2868_v14, %v1102_v2 }
 0x321   : > { %2422 = vpow.bf16 %v1206_v5 }
 0x322   : > { %v1105_v28 = vpop.xlane.xlu1 %1104  ;;  %2424 = vpow.bf16 %v1203_v30 }
 0x323   : > { %v2415_v29 = vpop.eup %2414  ;;  %v1142_v39 = vsub.f32 %v2875_v18, %v1105_v28  ;;  %v1143_v27 = vsub.f32 %v2878_v21, %v1105_v28  ;;  %v1093_v18 = vpop.xlane.xlu0 %1092 }
 0x324   : > { %v2417_v31 = vpop.eup %2416  ;;  %v1135_v56 = vsub.f32 %v2845_v4, %v1093_v18  ;;  %v1134_v22 = vsub.f32 %v2842_v3, %v1093_v18 }
 0x325   : > { %v1165_v40 = vpack.c.bf16 %v1143_v27, %v1141_v41  ;;  %1220 = vmatprep.subr.bf16.mxu0 %v2417_v31  ;;  %1261 = vmatprep.subr.bf16.mxu1 %v2417_v31  ;;  %v1164_v45 = vpack.c.bf16 %v1142_v39, %v1140_v34 }
 0x326   : > { %1221 = vmatpush1.bf16.xpose.msra.mxu0 %v2415_v29  ;;  %1262 = vmatpush1.bf16.xpose.msra.mxu1 %v2415_v29  ;;  %v1096_v25 = vpop.xlane.xlu1 %1095 }
 0x327   : > { %v1200_v42 = vmul.bf16 1069105081, %v1165_v40  ;;  %v2419_v33 = vpop.eup %2418  ;;  %v1197_v44 = vmul.bf16 1069105081, %v1164_v45  ;;  %v1137_v21 = vsub.f32 %v2857_v7, %v1096_v25  ;;  %v1136_v37 = vsub.f32 %v2849_v6, %v1096_v25 }
 0x328   : > { %1222 = vmatprep.subr.bf16.mxu0 %v2419_v33  ;;  %1263 = vmatprep.subr.bf16.mxu1 %v2419_v33  ;;  %v2421_v35 = vpop.eup %2420 }
 0x329   : > { %2426 = vpow.bf16 %v1200_v42 }
 0x32a   : > { %v1099_v15 = vpop.xlane.xlu1 %1098  ;;  %2428 = vpow.bf16 %v1197_v44 }
 0x32b   : > { %v1138_v14 = vsub.f32 %v2861_v10, %v1099_v15  ;;  %v1139_v46 = vsub.f32 %v2864_v11, %v1099_v15  ;;  %v1087_v11 = vpop.xlane.xlu0 %1086 }
 0x32c   : > { %v1131_v36 = vsub.f32 %v2831_v61, %v1087_v11  ;;  %v1130_v61 = vsub.f32 %v2828_v60, %v1087_v11 }
 0x32d   : > { %v1163_v53 = vpack.c.bf16 %v1139_v46, %v1137_v21  ;;  %v1162_v12 = vpack.c.bf16 %v1138_v14, %v1136_v37 }
 0x32e   : > { %1223 = vmatpush1.bf16.xpose.msra.mxu0 %v2421_v35  ;;  %1264 = vmatpush1.bf16.xpose.msra.mxu1 %v2421_v35  ;;  %v1090_v62 = vpop.xlane.xlu1 %1089 }
 0x32f   : > { %v1194_v13 = vmul.bf16 1069105081, %v1163_v53  ;;  %v1133_v17 = vsub.f32 %v2838_v0, %v1090_v62  ;;  %v2423_v20 = vpop.eup %2422  ;;  %v1191_v23 = vmul.bf16 1069105081, %v1162_v12  ;;  %v1132_v6 = vsub.f32 %v2835_v63, %v1090_v62  ;;  %v1081_v19 = vpop.xlane.xlu0 %1080 }
 0x330   : > { %1224 = vmatprep.subr.bf16.mxu0 %v2423_v20  ;;  %1265 = vmatprep.subr.bf16.mxu1 %v2423_v20  ;;  %v2425_v32 = vpop.eup %2424  ;;  %v1127_v2 = vsub.f32 %v2817_v55, %v1081_v19 }
 0x331   : > { %v1161_v7 = vpack.c.bf16 %v1135_v56, %v1133_v17  ;;  %2430 = vpow.bf16 %v1194_v13  ;;  %v1160_v0 = vpack.c.bf16 %v1134_v22, %v1132_v6 }
 0x332   : > { %v1084_v10 = vpop.xlane.xlu1 %1083  ;;  %2432 = vpow.bf16 %v1191_v23 }
 0x333   : > { %v1188_v9 = vmul.bf16 1069105081, %v1161_v7  ;;  %v1129_v4 = vsub.f32 %v2824_v58, %v1084_v10  ;;  %v1185_v63 = vmul.bf16 1069105081, %v1160_v0  ;;  %v1128_v8 = vsub.f32 %v2821_v57, %v1084_v10 }
 0x335   : > { %2434 = vpow.bf16 %v1188_v9  ;;  %v1159_v59 = vpack.c.bf16 %v1131_v36, %v1129_v4  ;;  %v1158_v38 = vpack.c.bf16 %v1130_v61, %v1128_v8 }
 0x336   : > { %1225 = vmatpush1.bf16.xpose.msra.mxu0 %v2425_v32  ;;  %1266 = vmatpush1.bf16.xpose.msra.mxu1 %v2425_v32  ;;  %v1078_v26 = vpop.xlane.xlu1 %1077  ;;  %2436 = vpow.bf16 %v1185_v63 }
 0x337   : > { %v2427_v24 = vpop.eup %2426  ;;  %v1182_v58 = vmul.bf16 1069105081, %v1159_v59  ;;  %v1125_v16 = vsub.f32 %v2808_v52, %v1078_v26  ;;  %v1179_v29 = vmul.bf16 1069105081, %v1158_v38  ;;  %v1124_v57 = vsub.f32 %v2806_v51, %v1078_v26 }
 0x338   : > { %1226 = vmatprep.subr.bf16.mxu0 %v2427_v24  ;;  %1267 = vmatprep.subr.bf16.mxu1 %v2427_v24  ;;  %v2429_v3 = vpop.eup %2428  ;;  %v1126_v52 = vsub.f32 %v2812_v54, %v1081_v19  ;;  %v614_v54 = vpop.permute.xlu0 %613 }
 0x339   : > { %2438 = vpow.bf16 %v1182_v58  ;;  %v1157_v28 = vpack.c.bf16 %v1127_v2, %v1125_v16  ;;  %v689_v45 = vadd.f32 %v2803_v50, %v614_v54  ;;  %v687_v18 = vadd.f32 %v2798_v49, %v614_v54 }
 0x33a   : > { %2440 = vpow.bf16 %v1179_v29  ;;  %v1156_v55 = vpack.c.bf16 %v1126_v52, %v1124_v57  ;;  %v609_v40 = vpop.permute.xlu1 %608 }
 0x33b   : > { %v1176_v30 = vmul.bf16 1069105081, %v1157_v28  ;;  %v685_v25 = vadd.f32 %v2796_v48, %v609_v40  ;;  %v683_v15 = vadd.f32 %v2794_v47, %v609_v40 }
 0x33c   : > { %v1173_v60 = vmul.bf16 1069105081, %v1156_v55  ;;  %v1322_v50 = vpop.permute.xlu0 %1321 }
 0x33d   : > { %2442 = vpow.bf16 %v1176_v30  ;;  %v817_v33 = vpack.c.bf16 %v689_v45, %v685_v25  ;;  %v816_v44 = vpack.c.bf16 %v687_v18, %v683_v15 }
 0x33e   : > { %1227 = vmatpush1.bf16.xpose.msra.mxu0 %v2429_v3  ;;  %1268 = vmatpush1.bf16.xpose.msra.mxu1 %v2429_v3  ;;  %2444 = vpow.bf16 %v1173_v60  ;;  %v1318_v21 = vpop.permute.xlu1 %1317 }
 0x33f   : > { %v2431_v5 = vpop.eup %2430 }
 0x340   : > { %1228 = vmatprep.subr.bf16.mxu0 %v2431_v5  ;;  %1269 = vmatprep.subr.bf16.mxu1 %v2431_v5  ;;  %v2433_v41 = vpop.eup %2432  ;;  %v1326_v49 = vpop.permute.xlu0 %1325 }
 0x342   : > { %v1320_v48 = vpop.permute.xlu1 %1319 }
 0x343   : > { %v2435_v39 = vpop.eup %2434 }
 0x344   : > { %v2437_v27 = vpop.eup %2436  ;;  %v1330_v46 = vpop.permute.xlu0 %1329 }
 0x346   : > { %1229 = vmatpush1.bf16.xpose.msra.mxu0 %v2433_v41  ;;  %1270 = vmatpush1.bf16.xpose.msra.mxu1 %v2433_v41  ;;  %v1324_v47 = vpop.permute.xlu1 %1323 }
 0x347   : > { %1230 = vmatprep.subr.bf16.mxu0 %v2435_v39  ;;  %1271 = vmatprep.subr.bf16.mxu1 %v2435_v39  ;;  %v2439_v31 = vpop.eup %2438 }
 0x348   : > { %v2441_v51 = vpop.eup %2440 }
 0x34a   : > { %v1328_v14 = vpop.permute.xlu1 %1327 }
 0x34b   : > { %v2443_v34 = vpop.eup %2442 }
 0x34c   : > { %v2445_v42 = vpop.eup %2444 }
 0x34e   : > { %1231 = vmatpush1.bf16.xpose.msra.mxu0 %v2437_v27  ;;  %1272 = vmatpush1.bf16.xpose.msra.mxu1 %v2437_v27  ;;  %v1332_v35 = vpop.permute.xlu1 %1331 }
 0x34f   : > { %1232 = vmatprep.subr.bf16.mxu0 %v2439_v31  ;;  %1273 = vmatprep.subr.bf16.mxu1 %v2439_v31 }
 0x356   : > { %1233 = vmatpush1.bf16.xpose.msra.mxu0 %v2441_v51  ;;  %1274 = vmatpush1.bf16.xpose.msra.mxu1 %v2441_v51 }
 0x357   : > { %1234 = vmatprep.subr.bf16.mxu0 %v2443_v34  ;;  %1275 = vmatprep.subr.bf16.mxu1 %v2443_v34 }
 0x35a   : > { %v3045_v37 = vpop.f32.mrf.mxu0 }
 0x35c   : > { %v3047_v53 = vpop.f32.mrf.mxu0 }
 0x35e   : > { %1235 = vmatpush1.bf16.xpose.msra.mxu0 %v2445_v42  ;;  %1276 = vmatpush1.bf16.xpose.msra.mxu1 %v2445_v42  ;;  %v3049_v56 = vpop.f32.mrf.mxu0 }
 0x35f   : > { %1371 = vmatprep.subr.bf16.mxu0 %v817_v33 }
 0x360   : > { %v3051_v62 = vpop.f32.mrf.mxu0 }
 0x365   : > { %1253 = vmatmul.mubr.bf16.vlgmr.msra.gmra.mxu0 %v3391_v43 }
 0x366   : > { %1372 = vmatpush1.bf16.msra.mxu0 %v816_v44  ;;  %1389 = vmatprep.mubr.bf16.mxu0 %v2590_v1 }
 0x36c   : > { %v3053_v12 = vpop.f32.mrf.mxu0 }
 0x36d   : > { %2211 = vmatmul.mubr.msk.bf16.vlgmr.msra.gmra.mxu0 %vm826_vm2, %v1318_v21  ;;  %3398 = vst [vmem:[#allocation10_spill] sm:$0xff] %v3053_v12 }
 0x36e   : > { %1399 = vmatprep.mubr.bf16.mxu0 %v2590_v1  ;;  %v3055_v13 = vpop.f32.mrf.mxu0 }
 0x375   : > { %2212 = vmatmul.mubr.msk.bf16.gmra.mxu0 %vm826_vm2, %v1320_v48 }
 0x376   : > { %1409 = vmatprep.mubr.bf16.mxu0 %v2590_v1 }
 0x37d   : > { %2213 = vmatmul.mubr.msk.bf16.gmra.mxu0 %vm826_vm2, %v1322_v50 }
 0x37e   : > { %1419 = vmatprep.mubr.bf16.mxu0 %v2590_v1 }
 0x385   : > { %2214 = vmatmul.mubr.msk.bf16.gmra.mxu0 %vm826_vm2, %v1324_v47 }
 0x386   : > { %1429 = vmatprep.mubr.bf16.mxu0 %v2590_v1 }
 0x38d   : > { %2215 = vmatmul.mubr.msk.bf16.gmra.mxu0 %vm826_vm2, %v1326_v49 }
 0x38e   : > { %1439 = vmatprep.mubr.bf16.mxu0 %v2590_v1 }
 0x395   : > { %2216 = vmatmul.mubr.msk.bf16.gmra.mxu0 %vm826_vm2, %v1328_v14 }
 0x396   : > { %1449 = vmatprep.mubr.bf16.mxu0 %v2590_v1 }
 0x39d   : > { %2217 = vmatmul.mubr.msk.bf16.gmra.mxu0 %vm826_vm2, %v1330_v46 }
 0x39e   : > { %1459 = vmatprep.mubr.bf16.mxu0 %v2590_v1  ;;  %v3057_v1 = vpop.f32.mrf.mxu0 }
 0x39f   : > { %3399 = vst [vmem:[#allocation11_spill] sm:$0xff] %v3057_v1 }
 0x3a0   : > { %v3059_v17 = vpop.f32.mrf.mxu0 }
 0x3a5   : > { %2218 = vmatmul.mubr.msk.bf16.gmra.mxu0 %vm826_vm2, %v1332_v35 }
 0x3a6   : > { %1759 = vmatprep.mubr.bf16.mxu0 %v3391_v43 }
 0x425   : > { %v3061_v20 = vpop.f32.mrf.mxu0 }
 0x426   : > { %3400 = vst [vmem:[#allocation12_spill] sm:$0xff] %v3061_v20 }
 0x427   : > { %v1256_v7 = vpop.f32.mrf.mxu0 }
 0x429   : > { %v1257_v10 = vpop.f32.mrf.mxu0 }
 0x42b   : > { %v1258_v11 = vpop.f32.mrf.mxu0 }
 0x42d   : > { %v3063_v23 = vpop.f32.mrf.mxu0 }
 0x42f   : > { %v3065_v6 = vpop.f32.mrf.mxu0 }
 0x430   : > { %v2283_v9 = vpack.c.bf16 %v3065_v6, %v3063_v23 }
 0x431   : > { %v3069_v4 = vpop.f32.mrf.mxu0 }
 0x432   : > { %2235 = vst [vmem:[%s2814_s25 + $0x80] sm:$0xff] %v2283_v9 }
 0x433   : > { %v3072_v32 = vpop.f32.mrf.mxu0 }
 0x434   : > { %v2284_v22 = vpack.c.bf16 %v3072_v32, %v3069_v4 }
 0x435   : > { %v3076_v36 = vpop.f32.mrf.mxu0 }
 0x436   : > { %2236 = vst [vmem:[%s2814_s25 + $0x88] sm:$0xff] %v2284_v22 }
 0x437   : > { %v3079_v0 = vpop.f32.mrf.mxu0 }
 0x438   : > { %v2285_v24 = vpack.c.bf16 %v3079_v0, %v3076_v36 }
 0x439   : > { %v3083_v59 = vpop.f32.mrf.mxu0 }
 0x43a   : > { %2237 = vst [vmem:[%s2814_s25 + $0x90] sm:$0xff] %v2285_v24 }
 0x43b   : > { %v3086_v26 = vpop.f32.mrf.mxu0 }
 0x43c   : > { %v2286_v19 = vpack.c.bf16 %v3086_v26, %v3083_v59 }
 0x43d   : > { %v3090_v63 = vpop.f32.mrf.mxu0 }
 0x43e   : > { %2238 = vst [vmem:[%s2814_s25 + $0x98] sm:$0xff] %v2286_v19 }
 0x43f   : > { %v3093_v8 = vpop.f32.mrf.mxu0 }
 0x440   : > { %v2287_v58 = vpack.c.bf16 %v3093_v8, %v3090_v63 }
 0x441   : > { %v3097_v16 = vpop.f32.mrf.mxu0 }
 0x442   : > { %2239 = vst [vmem:[%s2814_s25 + $0xa0] sm:$0xff] %v2287_v58  ;;  %v2178_v58 = vld [vmem:[%s3384_s4 + $0x40] sm:$0xff] }
 0x443   : > { %v3100_v3 = vpop.f32.mrf.mxu0 }
 0x444   : > { %v2288_v61 = vpack.c.bf16 %v3100_v3, %v3097_v16 }
 0x445   : > { %v3104_v2 = vpop.f32.mrf.mxu0 }
 0x446   : > { %2240 = vst [vmem:[%s2814_s25 + $0xa8] sm:$0xff] %v2288_v61  ;;  %v2179_v61 = vld [vmem:[%s3384_s4 + $0x48] sm:$0xff] }
 0x447   : > { %v3107_v38 = vpop.f32.mrf.mxu0 }
 0x448   : > { %v2289_v5 = vpack.c.bf16 %v3107_v38, %v3104_v2  ;;  %v1601_v28 = vmax.f32 %v3104_v2, %v3107_v38 }
 0x449   : > { %v3113_v29 = vpop.f32.mrf.mxu0 }
 0x44a   : > { %2241 = vst [vmem:[%s2814_s25 + $0xb0] sm:$0xff] %v2289_v5  ;;  %1602 = vmax.xlane.f32.xlu1 %v1601_v28  ;;  %v1598_v5 = vmax.f32 %v3097_v16, %v3100_v3  ;;  %v1592_v28 = vmax.f32 %v3083_v59, %v3086_v26 }
 0x44b   : > { %v3116_v57 = vpop.f32.mrf.mxu0 }
 0x44c   : > { %v2290_v30 = vpack.c.bf16 %v3116_v57, %v3113_v29  ;;  %v1604_v41 = vmax.f32 %v3113_v29, %v3116_v57 }
 0x44d   : > { %v3122_v52 = vpop.f32.mrf.mxu0 }
 0x44e   : > { %2242 = vst [vmem:[%s2814_s25 + $0xb8] sm:$0xff] %v2290_v30  ;;  %1605 = vmax.xlane.f32.xlu0 %v1604_v41  ;;  %v1595_v30 = vmax.f32 %v3090_v63, %v3093_v8  ;;  %v1586_v41 = vmax.f32 %v3069_v4, %v3072_v32 }
 0x44f   : > { %v3125_v39 = vpop.f32.mrf.mxu0 }
 0x450   : > { %v2291_v55 = vpack.c.bf16 %v3125_v39, %v3122_v52  ;;  %v1607_v60 = vmax.f32 %v3122_v52, %v3125_v39 }
 0x451   : > { %v3131_v27 = vpop.f32.mrf.mxu0 }
 0x452   : > { %2243 = vst [vmem:[%s2814_s25 + $0xc0] sm:$0xff] %v2291_v55  ;;  %1608 = vmax.xlane.f32.xlu1 %v1607_v60  ;;  %v1589_v55 = vmax.f32 %v3076_v36, %v3079_v0  ;;  %v1583_v60 = vmax.f32 %v3063_v23, %v3065_v6 }
 0x453   : > { %v3134_v31 = vpop.f32.mrf.mxu0 }
 0x454   : > { %v2292_v51 = vpack.c.bf16 %v3134_v31, %v3131_v27  ;;  %v1610_v34 = vmax.f32 %v3131_v27, %v3134_v31 }
 0x455   : > { %v3140_v40 = vpop.f32.mrf.mxu0 }
 0x456   : > { %2244 = vst [vmem:[%s2814_s25 + $0xc8] sm:$0xff] %v2292_v51  ;;  %1611 = vmax.xlane.f32.xlu0 %v1610_v34  ;;  %v2180_v51 = vld [vmem:[%s3384_s4 + $0x50] sm:$0xff]  ;;  %v2181_v34 = vld [vmem:[%s3384_s4 + $0x58] sm:$0xff] }
 0x457   : > { %v3143_v54 = vpop.f32.mrf.mxu0 }
 0x458   : > { %v2293_v25 = vpack.c.bf16 %v3143_v54, %v3140_v40  ;;  %v1613_v45 = vmax.f32 %v3140_v40, %v3143_v54 }
 0x459   : > { %v3149_v42 = vpop.f32.mrf.mxu0 }
 0x45a   : > { %2245 = vst [vmem:[%s2814_s25 + $0xd0] sm:$0xff] %v2293_v25  ;;  %1614 = vmax.xlane.f32.xlu1 %v1613_v45  ;;  %v3210_v25 = vld [vmem:[%s3385_s5] sm:$0xff]  }
 0x45b   : > { %v3152_v33 = vpop.f32.mrf.mxu0  ;;  %3401 = vst [vmem:[#allocation13_spill] sm:$0xff] %v3210_v25  ;;  %v1940_v45 = vld [vmem:[%s3386_s6] sm:$0xff] }
 0x45c   : > { %v2294_v15 = vpack.c.bf16 %v3152_v33, %v3149_v42  ;;  %v1616_v18 = vmax.f32 %v3149_v42, %v3152_v33 }
 0x45d   : > { %v3158_v44 = vpop.f32.mrf.mxu0 }
 0x45e   : > { %2246 = vst [vmem:[%s2814_s25 + $0xd8] sm:$0xff] %v2294_v15  ;;  %1617 = vmax.xlane.f32.xlu0 %v1616_v18  ;;  %v3220_v15 = vld [vmem:[%s3385_s5 + $0x8] sm:$0xff]   ;;  %v1942_v18 = vld [vmem:[%s3386_s6 + $0x10] sm:$0xff] }
 0x45f   : > { %v3161_v21 = vpop.f32.mrf.mxu0  ;;  %3402 = vst [vmem:[#allocation14_spill] sm:$0xff] %v3220_v15 }
 0x460   : > { %v2295_v48 = vpack.c.bf16 %v3161_v21, %v3158_v44  ;;  %v1619_v50 = vmax.f32 %v3158_v44, %v3161_v21 }
 0x461   : > { %v3167_v47 = vpop.f32.mrf.mxu0 }
 0x462   : > { %2247 = vst [vmem:[%s2814_s25 + $0xe0] sm:$0xff] %v2295_v48  ;;  %1620 = vmax.xlane.f32.xlu0 %v1619_v50  ;;  %v1941_v48 = vld [vmem:[%s3386_s6 + $0x8] sm:$0xff]  ;;  %v1943_v50 = vld [vmem:[%s3386_s6 + $0x18] sm:$0xff] }
 0x463   : > { %v3170_v49 = vpop.f32.mrf.mxu0 }
 0x464   : > { %v2296_v14 = vpack.c.bf16 %v3170_v49, %v3167_v47  ;;  %v1622_v46 = vmax.f32 %v3167_v47, %v3170_v49 }
 0x465   : > { %v3176_v35 = vpop.f32.mrf.mxu0 }
 0x466   : > { %2248 = vst [vmem:[%s2814_s25 + $0xe8] sm:$0xff] %v2296_v14  ;;  %1623 = vmax.xlane.f32.xlu0 %v1622_v46 }
 0x467   : > { %v1463_v7 = vpop.f32.mrf.mxu0 }
 0x468   : > { %v2297_v10 = vpack.c.bf16 %v1463_v7, %v3176_v35  ;;  %v1625_v11 = vmax.f32 %v3176_v35, %v1463_v7 }
 0x469   : > { %v1465_v9 = vpop.f32.mrf.mxu0 }
 0x46a   : > { %2249 = vst [vmem:[%s2814_s25 + $0xf0] sm:$0xff] %v2297_v10  ;;  %1626 = vmax.xlane.f32.xlu0 %v1625_v11 }
 0x46b   : > { %v1467_v22 = vpop.f32.mrf.mxu0 }
 0x46c   : > { %v2298_v24 = vpack.c.bf16 %v1467_v22, %v1465_v9  ;;  %v1628_v19 = vmax.f32 %v1465_v9, %v1467_v22 }
 0x46e   : > { %2250 = vst [vmem:[%s2814_s25 + $0xf8] sm:$0xff] %v2298_v24  ;;  %1629 = vmax.xlane.f32.xlu1 %v1628_v19 }
 0x47f   : > { %703 = vperm.xlu1 %2395, %v2178_v58  }
 0x480   : > { %708 = vperm.xlu0 %2394, %v2179_v61  }
 0x49f   : > { %1599 = vmax.xlane.f32.xlu0 %v1598_v5 }
 0x4a3   : > { %1593 = vmax.xlane.f32.xlu0 %v1592_v28  ;;  %1596 = vmax.xlane.f32.xlu1 %v1595_v30 }
 0x4a7   : > { %1587 = vmax.xlane.f32.xlu0 %v1586_v41  ;;  %1590 = vmax.xlane.f32.xlu1 %v1589_v55 }
 0x4ab   : > { %1584 = vmax.xlane.f32.xlu1 %v1583_v60 }
 0x4bc   : > { %713 = vperm.xlu1 %2395, %v2180_v51  }
 0x4bd   : > { %718 = vperm.xlu0 %2394, %v2181_v34  }
 0x4c0   : > { %1826 = vrot.lane.b32.xlu1 %v3210_v25, %s2591_s16 }
 0x4c1   : > { %1946 = vperm.xlu0 %2394, %v1940_v45  }
 0x4c4   : > { %1828 = vrot.lane.b32.xlu1 %v3220_v15, %s2591_s16  ;;  %s2300_s16 = sshll.u32 %s2580_s30, 12 }
 0x4c5   : > { %1956 = vperm.xlu0 %2394, %v1942_v18   ;;  %s3294_s12 = scalar_lea.hbm %s3388_s8, %s2300_s16 }
 0x4c8   : > { %1951 = vperm.xlu1 %2395, %v1941_v48  }
 0x4cc   : > { %1961 = vperm.xlu1 %2395, %v1943_v50  }
 0x4d3   : > { %v3237_v11 = vpop.xlane.xlu1 %1602 }
 0x4d7   : > { %v3233_v14 = vpop.xlane.xlu0 %1605 }
 0x4db   : > { %v1609_v19 = vpop.xlane.xlu1 %1608 }
 0x4df   : > { %v3235_v46 = vpop.xlane.xlu0 %1611 }
 0x4e3   : > { %v1615_v61 = vpop.xlane.xlu1 %1614 }
 0x4e7   : > { %v1618_v10 = vpop.xlane.xlu0 %1617 }
 0x4eb   : > { %v1621_v24 = vpop.xlane.xlu0 %1620 }
 0x4ec   : > { %v1656_v30 = vsub.f32 %v3161_v21, %v1621_v24  ;;  %v1654_v21 = vsub.f32 %v3152_v33, %v1618_v10 }
 0x4ef   : > { %v1624_v58 = vpop.xlane.xlu0 %1623 }
 0x4f0   : > { %v1658_v5 = vsub.f32 %v3170_v49, %v1624_v58  ;;  %v1657_v50 = vsub.f32 %v3167_v47, %v1624_v58  ;;  %v1652_v47 = vsub.f32 %v3143_v54, %v1615_v61 }
 0x4f2   : > { %v1676_v45 = vpack.c.bf16 %v1658_v5, %v1656_v30 }
 0x4f3   : > { %v1627_v28 = vpop.xlane.xlu0 %1626 }
 0x4f4   : > { %v1659_v55 = vsub.f32 %v3176_v35, %v1627_v28  ;;  %v1660_v60 = vsub.f32 %v1463_v7, %v1627_v28  ;;  %v1719_v12 = vmul.bf16 1069105081, %v1676_v45  ;;  %v1674_v28 = vpack.c.bf16 %v1654_v21, %v1652_v47 }
 0x4f7   : > { %v1630_v41 = vpop.xlane.xlu1 %1629 }
 0x4f8   : > { %v1661_v51 = vsub.f32 %v1465_v9, %v1630_v41  ;;  %v1662_v34 = vsub.f32 %v1467_v22, %v1630_v41  ;;  %v1655_v9 = vsub.f32 %v3158_v44, %v1621_v24 }
 0x4fa   : > { %v1677_v18 = vpack.c.bf16 %v1661_v51, %v1659_v55  ;;  %v1678_v48 = vpack.c.bf16 %v1662_v34, %v1660_v60  ;;  %v1675_v5 = vpack.c.bf16 %v1657_v50, %v1655_v9 }
 0x4fb   : > { %v704_v43 = vpop.permute.xlu1 %703  ;;  %v709_v15 = vpop.permute.xlu0 %708 }
 0x4fc   : > { %v1722_v20 = vmul.bf16 1069105081, %v1677_v18  ;;  %v1725_v25 = vmul.bf16 1069105081, %v1678_v48  ;;  %v778_v49 = vadd.f32 %v3045_v37, %v704_v43  ;;  %v780_v1 = vadd.f32 %v3047_v53, %v704_v43 }
 0x4fd   : > { %v782_v35 = vadd.f32 %v3049_v56, %v709_v15  ;;  %v784_v7 = vadd.f32 %v3051_v62, %v709_v15  ;;  %v1653_v43 = vsub.f32 %v3149_v42, %v1618_v10  ;;  %v1716_v37 = vmul.bf16 1069105081, %v1675_v5 }
 0x4fe   : > { %2446 = vpow.bf16 %v1722_v20  ;;  %v1650_v53 = vsub.f32 %v3134_v31, %v3235_v46  ;;  %v1713_v56 = vmul.bf16 1069105081, %v1674_v28  ;;  %v1651_v62 = vsub.f32 %v3140_v40, %v1615_v61 }
 0x4ff   : > { %2448 = vpow.bf16 %v1725_v25  ;;  %v818_v22 = vpack.c.bf16 %v782_v35, %v778_v49  ;;  %v819_v58 = vpack.c.bf16 %v784_v7, %v780_v1  ;;  %v1648_v20 = vsub.f32 %v3125_v39, %v1609_v19 }
 0x500   : > { %2450 = vpow.bf16 %v1719_v12  ;;  %v1673_v54 = vpack.c.bf16 %v1653_v43, %v1651_v62  ;;  %v1649_v12 = vsub.f32 %v3131_v27, %v3235_v46  ;;  %v1646_v42 = vsub.f32 %v3116_v57, %v3233_v14 }
 0x501   : > { %1293 = vmatprep.mubr.bf16.mxu1 %v819_v58  ;;  %2452 = vpow.bf16 %v1716_v37  ;;  %v1672_v33 = vpack.c.bf16 %v1650_v53, %v1648_v20  ;;  %v1647_v31 = vsub.f32 %v3122_v52, %v1609_v19  ;;  %v1644_v39 = vsub.f32 %v3107_v38, %v3237_v11 }
 0x502   : > { %1294 = vmatmul.mubr.bf16.vlgmr.msra.gmra.mxu1 %v818_v22  ;;  %2454 = vpow.bf16 %v1713_v56  ;;  %v1710_v44 = vmul.bf16 1069105081, %v1673_v54  ;;  %v1645_v57 = vsub.f32 %v3113_v29, %v3233_v14  ;;  %v1643_v19 = vsub.f32 %v3104_v2, %v3237_v11 }
 0x503   : > { %v1707_v15 = vmul.bf16 1069105081, %v1672_v33  ;;  %v1671_v10 = vpack.c.bf16 %v1649_v12, %v1647_v31  ;;  %v1670_v27 = vpack.c.bf16 %v1646_v42, %v1644_v39  ;;  %v3403_v12 = vld [vmem:[#allocation10_spill] sm:$0xff]  ;;  %v3406_v39 = vld [vmem:[#allocation13_spill] sm:$0xff] }
 0x504   : > { %2456 = vpow.bf16 %v1710_v44  ;;  %v1669_v38 = vpack.c.bf16 %v1645_v57, %v1643_v19 }
 0x505   : > { %2458 = vpow.bf16 %v1707_v15  ;;  %v1704_v46 = vmul.bf16 1069105081, %v1671_v10  ;;  %v1701_v24 = vmul.bf16 1069105081, %v1670_v27  ;;  %v3407_v10 = vld [vmem:[#allocation12_spill] sm:$0xff]  ;;  %v1302_v27 = vlaneseq }
 0x506   : > { %v1698_v30 = vmul.bf16 1069105081, %v1669_v38 }
 0x507   : > { %2460 = vpow.bf16 %v1704_v46  ;;  %v1303_v57 = vshrl.u32 %v1302_v27, 7 }
 0x508   : > { %2462 = vpow.bf16 %v1701_v24 }
 0x509   : > { %2464 = vpow.bf16 %v1698_v30  ;;  %v1304_v46 = vsub.s32 0, %v1303_v57 }
 0x50c   : > { %v2447_v1 = vpop.eup %2446 }
 0x50d   : > { %v2449_v25 = vpop.eup %2448 }
 0x50e   : > { %1727 = vmatprep.subr.bf16.mxu0 %v2449_v25  ;;  %1768 = vmatprep.subr.bf16.mxu1 %v2449_v25  ;;  %v2451_v40 = vpop.eup %2450  ;;  %v3404_v25 = vld [vmem:[#allocation11_spill] sm:$0xff] }
 0x50f   : > { %1728 = vmatpush1.bf16.xpose.msra.mxu0 %v2447_v1  ;;  %1769 = vmatpush1.bf16.xpose.msra.mxu1 %v2447_v1  ;;  %v2453_v52 = vpop.eup %2452 }
 0x510   : > { %1729 = vmatprep.subr.bf16.mxu0 %v2451_v40  ;;  %1770 = vmatprep.subr.bf16.mxu1 %v2451_v40  ;;  %v2455_v61 = vpop.eup %2454  ;;  %v3405_v40 = vmov 1065369472  }
 0x512   : > { %v2457_v41 = vpop.eup %2456 }
 0x513   : > { %v2459_v55 = vpop.eup %2458 }
 0x515   : > { %v2461_v29 = vpop.eup %2460 }
 0x516   : > { %v2463_v14 = vpop.eup %2462 }
 0x517   : > { %1730 = vmatpush1.bf16.xpose.msra.mxu0 %v2453_v52  ;;  %1771 = vmatpush1.bf16.xpose.msra.mxu1 %v2453_v52  ;;  %v2465_v48 = vpop.eup %2464 }
 0x518   : > { %1731 = vmatprep.subr.bf16.mxu0 %v2455_v61  ;;  %1772 = vmatprep.subr.bf16.mxu1 %v2455_v61 }
 0x51f   : > { %1732 = vmatpush1.bf16.xpose.msra.mxu0 %v2457_v41  ;;  %1773 = vmatpush1.bf16.xpose.msra.mxu1 %v2457_v41 }
 0x520   : > { %1733 = vmatprep.subr.bf16.mxu0 %v2459_v55  ;;  %1774 = vmatprep.subr.bf16.mxu1 %v2459_v55 }
 0x527   : > { %1734 = vmatpush1.bf16.xpose.msra.mxu0 %v2461_v29  ;;  %1775 = vmatpush1.bf16.xpose.msra.mxu1 %v2461_v29 }
 0x528   : > { %1735 = vmatprep.subr.bf16.mxu0 %v2463_v14  ;;  %1776 = vmatprep.subr.bf16.mxu1 %v2463_v14  ;;  %v1600_v2 = vpop.xlane.xlu0 %1599  ;;  %v3408_v14 = vld [vmem:[#allocation14_spill] sm:$0xff] }
 0x529   : > { %v1641_v51 = vsub.f32 %v3097_v16, %v1600_v2  ;;  %v1642_v34 = vsub.f32 %v3100_v3, %v1600_v2 }
 0x52c   : > { %v1597_v11 = vpop.xlane.xlu1 %1596  ;;  %v1594_v60 = vpop.xlane.xlu0 %1593 }
 0x52d   : > { %v1639_v45 = vsub.f32 %v3090_v63, %v1597_v11  ;;  %v1640_v18 = vsub.f32 %v3093_v8, %v1597_v11  ;;  %v1638_v21 = vsub.f32 %v3086_v26, %v1594_v60  ;;  %v1637_v63 = vsub.f32 %v3083_v59, %v1594_v60 }
 0x52f   : > { %v1667_v50 = vpack.c.bf16 %v1641_v51, %v1639_v45  ;;  %v1668_v49 = vpack.c.bf16 %v1642_v34, %v1640_v18  ;;  %1736 = vmatpush1.bf16.xpose.msra.mxu0 %v2465_v48  ;;  %1777 = vmatpush1.bf16.xpose.msra.mxu1 %v2465_v48 }
 0x530   : > { %v1591_v35 = vpop.xlane.xlu1 %1590  ;;  %v1588_v22 = vpop.xlane.xlu0 %1587 }
 0x531   : > { %v1692_v7 = vmul.bf16 1069105081, %v1667_v50  ;;  %v1695_v9 = vmul.bf16 1069105081, %v1668_v49  ;;  %v1635_v47 = vsub.f32 %v3076_v36, %v1591_v35  ;;  %v1636_v16 = vsub.f32 %v3079_v0, %v1591_v35 }
 0x532   : > { %v1634_v28 = vsub.f32 %v3072_v32, %v1588_v22  ;;  %v1633_v20 = vsub.f32 %v3069_v4, %v1588_v22 }
 0x533   : > { %2466 = vpow.bf16 %v1692_v7  ;;  %v1666_v3 = vpack.c.bf16 %v1638_v21, %v1636_v16  ;;  %v1665_v58 = vpack.c.bf16 %v1637_v63, %v1635_v47 }
 0x534   : > { %2468 = vpow.bf16 %v1695_v9  ;;  %v1585_v8 = vpop.xlane.xlu1 %1584 }
 0x535   : > { %v1689_v5 = vmul.bf16 1069105081, %v1666_v3  ;;  %v1632_v26 = vsub.f32 %v3065_v6, %v1585_v8  ;;  %v1686_v36 = vmul.bf16 1069105081, %v1665_v58  ;;  %v1631_v0 = vsub.f32 %v3063_v23, %v1585_v8 }
 0x537   : > { %v1664_v43 = vpack.c.bf16 %v1634_v28, %v1632_v26  ;;  %2470 = vpow.bf16 %v1689_v5  ;;  %v1663_v33 = vpack.c.bf16 %v1633_v20, %v1631_v0 }
 0x538   : > { %v714_v37 = vpop.permute.xlu1 %713  ;;  %v719_v53 = vpop.permute.xlu0 %718  ;;  %2472 = vpow.bf16 %v1686_v36 }
 0x539   : > { %v790_v56 = vadd.f32 %v3055_v13, %v714_v37  ;;  %v1683_v62 = vmul.bf16 1069105081, %v1664_v43  ;;  %v794_v59 = vadd.f32 %v3059_v17, %v719_v53  ;;  %v1680_v32 = vmul.bf16 1069105081, %v1663_v33 }
 0x53a   : > { %v788_v44 = vadd.f32 %v3403_v12, %v714_v37  ;;  %v792_v42 = vadd.f32 %v3404_v25, %v719_v53 }
 0x53b   : > { %v821_v54 = vpack.c.bf16 %v794_v59, %v790_v56  ;;  %2474 = vpow.bf16 %v1683_v62 }
 0x53c   : > { %2476 = vpow.bf16 %v1680_v32  ;;  %v820_v15 = vpack.c.bf16 %v792_v42, %v788_v44  ;;  %v1827_v31 = vpop.permute.xlu1 %1826 }
 0x53d   : > { %1800 = vmatprep.mubr.bf16.mxu1 %v821_v54  ;;  %2478 = vrcp.f32 %v3407_v10 }
 0x540   : > { %v1829_v9 = vpop.permute.xlu1 %1828 }
 0x541   : > { %v2467_v6 = vpop.eup %2466 }
 0x542   : > { %v2469_v1 = vpop.eup %2468 }
 0x543   : > { %1737 = vmatprep.subr.bf16.mxu0 %v2469_v1  ;;  %1778 = vmatprep.subr.bf16.mxu1 %v2469_v1 }
 0x544   : > { %1738 = vmatpush1.bf16.xpose.msra.mxu0 %v2467_v6  ;;  %1779 = vmatpush1.bf16.xpose.msra.mxu1 %v2467_v6 }
 0x545   : > { %v2471_v23 = vpop.eup %2470 }
 0x546   : > { %1739 = vmatprep.subr.bf16.mxu0 %v2471_v23  ;;  %1780 = vmatprep.subr.bf16.mxu1 %v2471_v23  ;;  %v2473_v13 = vpop.eup %2472 }
 0x549   : > { %v2475_v17 = vpop.eup %2474 }
 0x54a   : > { %v2477_v4 = vpop.eup %2476 }
 0x54b   : > { %v2479_v24 = vpop.eup %2478 }
 0x54c   : > { %1740 = vmatpush1.bf16.xpose.msra.mxu0 %v2473_v13  ;;  %1781 = vmatpush1.bf16.xpose.msra.mxu1 %v2473_v13  ;;  %v1305_v61 = vrot.slane %v2479_v24, %v1304_v46 }
 0x54d   : > { %1741 = vmatprep.subr.bf16.mxu0 %v2475_v17  ;;  %1782 = vmatprep.subr.bf16.mxu1 %v2475_v17 }
 0x554   : > { %1742 = vmatpush1.bf16.xpose.msra.mxu0 %v2477_v4  ;;  %1783 = vmatpush1.bf16.xpose.msra.mxu1 %v2477_v4 }
 0x55b   : > { %1760 = vmatmul.mubr.bf16.vlgmr.msra.gmra.mxu0 %v3405_v40  ;;  %1801 = vmatmul.mubr.bf16.vlgmr.msra.gmra.mxu1 %v820_v15 }
 0x55c   : > { %2324 = vmatprep.mubr.msk.bf16.mxu1 %vm826_vm2, %v3406_v39  ;;  %2318 = vmatprep.mubr.msk.bf16.mxu0 %vm826_vm2, %v1827_v31 }
 0x5c2   : > { %v1295_v52 = vpop.f32.mrf.mxu1 }
 0x5c3   : > { %v1306_v30 = vmul.f32 %v1305_v61, %v1295_v52 }
 0x5c4   : > { %v1297_v19 = vpop.f32.mrf.mxu1 }
 0x5c6   : > { %v1298_v38 = vpop.f32.mrf.mxu1 }
 0x5c7   : > { %v1307_v41 = vmul.f32 %v1305_v61, %v1298_v38 }
 0x5c8   : > { %v1300_v55 = vpop.f32.mrf.mxu1 }
 0x5c9   : > { %v1308_v29 = vpack.c.bf16 %v1307_v41, %v1306_v30 }
 0x5cb   : > { %2322 = vmatprep.subr.bf16.mxu1 %v1308_v29 }
 0x5cc   : > { %2323 = vmatpush3.bf16.msra.mxu1 %v1308_v29 }
 0x5cf   : > { %2325 = vmatmul.mubr.msk.bf16.vlgmr.msra.gmra.mxu1 %vm826_vm2, %v3408_v14 }
 0x61b   : > { %v1761_v2 = vpop.f32.mrf.mxu0  ;;  %v1802_v11 = vpop.f32.mrf.mxu1 }
 0x61c   : > { %2480 = vrcp.f32 %v1761_v2 }
 0x61d   : > { %v1763_v60 = vpop.f32.mrf.mxu0  ;;  %v1804_v51 = vpop.f32.mrf.mxu1 }
 0x61f   : > { %v1764_v34 = vpop.f32.mrf.mxu0  ;;  %v1805_v45 = vpop.f32.mrf.mxu1 }
 0x621   : > { %v1765_v18 = vpop.f32.mrf.mxu0  ;;  %v1807_v48 = vpop.f32.mrf.mxu1 }
 0x629   : > { %v2481_v50 = vpop.eup %2480 }
 0x62a   : > { %v1812_v49 = vrot.slane %v2481_v50, %v1304_v46 }
 0x62c   : > { %v1813_v21 = vmul.f32 %v1812_v49, %v1802_v11  ;;  %v1814_v35 = vmul.f32 %v1812_v49, %v1805_v45 }
 0x62e   : > { %v1815_v7 = vpack.c.bf16 %v1814_v35, %v1813_v21 }
 0x630   : > { %2316 = vmatprep.subr.bf16.mxu0 %v1815_v7 }
 0x631   : > { %2317 = vmatpush3.bf16.msra.mxu0 %v1815_v7 }
 0x634   : > { %2319 = vmatmul.mubr.msk.bf16.vlgmr.msra.gmra.mxu0 %vm826_vm2, %v1829_v9 }
 0x635   : > { %2495 = shalt.err (!%p2492_p5)
}
 0x636   : > { %s2496_s25 = scalar_lea.hbm %s3294_s12, 4096  ;;  %s2500_s16 = scalar_lea.hbm %s3388_s8, 8192 }
 0x637   : > { %p2497_p6 = scmp.ne.s32.totalorder %s3294_s12, %s2496_s25  ;;  %p2501_p10 = scmp.lt.s32.totalorder %s3294_s12, %s3388_s8 }
 0x638   : > { %p2502_p11 = scmp.lt.s32.totalorder %s2500_s16, %s2496_s25 }
 0x639   : > { %p2498_p7 = pnand %p2497_p6, %p2682_p4 }
 0x63a   : > { %p2503_p12 = por %p2502_p11, %p2501_p10 }
 0x63b   : > { %p2499_p9 = pneg %p2498_p7 }
 0x63d   : > { %p2504_p13 = pnand %p2503_p12, %p2499_p9 }
 0x63f   : > { %2507 = shalt.err (!%p2504_p13)
}
 0x640   : > { %s2594_s21 = smov 128   ;;  %s2595_s11 = smov 8   ;;  %v1947_v16 = vpop.permute.xlu0 %1946  ;;  %v1952_v63 = vpop.permute.xlu1 %1951 }
 0x641   : > { %2330 = dma.vmem_to_hbm [thread:$0]  (%p2682_p4), %s3297_s26, 4096, %s3294_s12, %s1978_s14, %s2594_s21, %s2594_s21, %s2595_s11  }
 0x642   : > { %s2150_s9 = sshll.u32 %s2801_s23, 5  ;;  %s2299_s26 = sshll.u32 %s2580_s30, 9 }
 0x643   : > { %s354_s13 = scalar_lea.vmem [#allocation2], %s2150_s9  ;;  %s3332_s19 = scalar_lea.hbm %s3387_s7, %s2299_s26 }
 0x644   : > { %v1957_v8 = vpop.permute.xlu0 %1956  ;;  %v1962_v53 = vpop.permute.xlu1 %1961  ;;  %s1992_s12 = sshll.u32 %s354_s13, 4  ;;  %s1973_s20 = scalar_lea.sflag [#allocation3], %s2801_s23  ;;  %s3327_s12 = int_to_ptr.vmem [resolvable:$true] %s1992_s12 }
 0x645   : > { %s2508_s16 = scalar_lea.vmem %s3327_s12, 512  ;;  %s2596_s30 = smov [#allocation2]  }
 0x646   : > { %p2509_p0 = scmp.ne.s32.totalorder %s3327_s12, %s2508_s16  ;;  %s2512_s22 = sshll.u32 %s2596_s30, 4  ;;  %s2513_s22 = int_to_ptr.vmem [resolvable:$false] %s2512_s22 }
 0x647   : > { %s2514_s24 = scalar_lea.vmem %s2513_s22, 1024  ;;  %p2515_p3 = scmp.lt.s32.totalorder %s3327_s12, %s2513_s22 }
 0x648   : > { %p2510_p1 = pnand %p2509_p0, %p2682_p4  ;;  %p2516_p5 = scmp.lt.s32.totalorder %s2514_s24, %s2508_s16 }
 0x64a   : > { %p2511_p2 = pneg %p2510_p1  ;;  %p2517_p6 = por %p2516_p5, %p2515_p3 }
 0x64c   : > { %p2518_p7 = pnand %p2517_p6, %p2511_p2 }
 0x68f   : > { %v2326_v47 = vpop.f32.mrf.mxu1 }
 0x691   : > { %v1925_v22 = vpop.f32.mrf.mxu1 }
 0x693   : > { %v2327_v28 = vpop.f32.mrf.mxu1 }
 0x695   : > { %v1928_v56 = vpop.f32.mrf.mxu1 }
 0x6f4   : > { %v2320_v3 = vpop.f32.mrf.mxu0 }
 0x6f5   : > { %v1934_v58 = vadd.f32 %v2326_v47, %v2320_v3 }
 0x6f6   : > { %v1870_v5 = vpop.f32.mrf.mxu0 }
 0x6f7   : > { %v1966_v26 = vadd.f32 %v1957_v8, %v1934_v58  ;;  %v1926_v43 = vadd.f32 %v1925_v22, %v1870_v5 }
 0x6f8   : > { %v2321_v37 = vpop.f32.mrf.mxu0 }
 0x6f9   : > { %1970 = vst [vmem:[%s354_s13 + $0x10] sm:$0xff] %v1966_v26  ;;  %v1964_v36 = vadd.f32 %v1947_v16, %v1926_v43  ;;  %v1937_v0 = vadd.f32 %v2327_v28, %v2321_v37 }
 0x6fa   : > { %v1873_v62 = vpop.f32.mrf.mxu0 }
 0x6fb   : > { %1968 = vst [vmem:[%s354_s13] sm:$0xff] %v1964_v36  ;;  %v1967_v59 = vadd.f32 %v1962_v53, %v1937_v0  ;;  %v1929_v20 = vadd.f32 %v1928_v56, %v1873_v62 }
 0x6fd   : > { %1971 = vst [vmem:[%s354_s13 + $0x18] sm:$0xff] %v1967_v59  ;;  %v1965_v54 = vadd.f32 %v1952_v63, %v1929_v20 }
 0x6ff   : > { %1969 = vst [vmem:[%s354_s13 + $0x8] sm:$0xff] %v1965_v54 }
 0x700   : > { %2521 = shalt.err (!%p2518_p7)
}
 0x701   : > { %s2522_s9 = scalar_lea.hbm %s3332_s19, 512  ;;  %s2526_s26 = scalar_lea.hbm %s3387_s7, 1024 }
 0x702   : > { %p2523_p9 = scmp.ne.s32.totalorder %s3332_s19, %s2522_s9  ;;  %p2527_p12 = scmp.lt.s32.totalorder %s3332_s19, %s3387_s7 }
 0x703   : > { %p2528_p13 = scmp.lt.s32.totalorder %s2526_s26, %s2522_s9 }
 0x704   : > { %p2524_p10 = pnand %p2523_p9, %p2682_p4 }
 0x705   : > { %p2529_p0 = por %p2528_p13, %p2527_p12 }
 0x706   : > { %p2525_p11 = pneg %p2524_p10 }
 0x708   : > { %p2530_p1 = pnand %p2529_p0, %p2525_p11 }
 0x70a   : > { %2533 = shalt.err (!%p2530_p1)
}
 0x70b   : > { %2329 = dma.vmem_to_hbm [thread:$0]  (%p2682_p4), %s3327_s12, 512, %s3332_s19, %s1973_s20, %s2594_s21, %s2594_s21, %s2595_s11  }
 0x70c PF: > { %p2340_p2 = scmp.ge.s32.totalorder %s2588_s10, 2  ;;  %s2026_s16 = sand.u32 1, %s2568_s27  }
 0x70d   : > { %s2027_s30 = scalar_lea.sflag [#allocation3], %s2026_s16 }
 0x70e   : > { %p2334_p3 = pnand %p2340_p2, %p2689_p8 }
 0x710   : > { %p2335_p5 = pneg %p2334_p3 }
 0x712   : > { %2559 = dma.done.wait (%p2335_p5), %s2027_s30, 512  }
 0x713   : > { %2561 = vsyncadd (%p2335_p5), %s2027_s30, 4294966784  ;;  %s2036_s22 = scalar_lea.sflag [#allocation5], %s2026_s16 }
 0x714   : > { %2563 = dma.done.wait (%p2335_p5), %s2036_s22, 4096  }
 0x715   : > { %2565 = vsyncadd (%p2335_p5), %s2036_s22, 4294963200  ;;  %s25_s10 = sadd.s32 1, %s2588_s10   ;;  %s3409_s30 = sld [smem:[#allocation8_spill]] }
 0x716   : > { %p22_p6 = scmp.ge.s32.totalorder %s25_s10, 4   ;;  %s3410_s9 = sld [smem:[#allocation9_spill]] }
 0x717   : > { %s3411_s27 = smov %s2572_s28  ;;  %s3412_s28 = smov %s2576_s29 }
 0x718   : > { %s3413_s29 = smov %s2695_s18  ;;  %24 = sbr.rel (!%p22_p6) target bundleno = 6 (0x6), region = 111 }
 0x71d   :  { %2041 = vsyncpa [#allocation3], 1 }
 0x71e   :  { %2043 = vsyncpa [#allocation3 + $0x1], 1 }
 0x71f   :  { %2044 = vsyncpa [#allocation5], 1 }
 0x720   :  { %2046 = vsyncpa [#allocation5 + $0x1], 1 }

</bundles_post_ra>
